<compile_context>
chip_gen: v7x
topology: tpu7x:2x2x1
jax: 0.10.0
libtpu: 0.0.40
codegen_flags: <defaults>
</compile_context>

<pallas_src>
import functools

import jax
import jax.numpy as jnp
from jax.experimental import pallas as pl
from jax.experimental.pallas import tpu as pltpu

EPS_NORM = 1e-9
EPS_ATT = 1e-5


# ---------------------------------------------------------------- helpers (pure jnp, usable in-kernel)
def _l2norm(v):
    n = jnp.sqrt(jnp.sum(v * v, axis=-1, keepdims=True))
    return v / (n + EPS_NORM)


def _softmax(s, axis):
    m = jnp.max(s, axis=axis, keepdims=True)
    e = jnp.exp(s - m)
    return e / jnp.sum(e, axis=axis, keepdims=True)


def _dot(a, b):          # (m,k) @ (k,n), f32 accumulation on the MXU
    return jax.lax.dot_general(a, b, (((1,), (0,)), ((), ())),
                               preferred_element_type=jnp.float32)


def _dot_nt(a, b):       # (m,d),(n,d) -> (m,n)
    return jax.lax.dot_general(a, b, (((1,), (1,)), ((), ())),
                               preferred_element_type=jnp.float32)


def _bdot(a, b):         # (B,m,k) @ (B,k,n) -> (B,m,n)
    return jax.lax.dot_general(a, b, (((2,), (1,)), ((0,), (0,))),
                               preferred_element_type=jnp.float32)


def _bdot_nt(a, b):      # (B,m,d),(B,n,d) -> (B,m,n)
    return jax.lax.dot_general(a, b, (((2,), (2,)), ((0,), (0,))),
                               preferred_element_type=jnp.float32)


# ---------------------------------------------------------------- spec / budget helpers
@functools.lru_cache(maxsize=None)
def _vmem_limit_bytes():
    """Generation-aware VMEM budget: capacity minus ~16 MiB headroom, capped at 100 MiB
    (v5e/v6e have 128 MiB physical, v7x only 64 MiB)."""
    cap = 128 * 1024 * 1024
    try:
        cap = int(pltpu.get_tpu_info().vmem_capacity_bytes)
    except Exception:  # noqa: BLE001 - fall back to the v5e/v6e capacity
        pass
    return int(max(32 * 1024 * 1024, min(cap - 16 * 1024 * 1024, 100 * 1024 * 1024)))


@functools.lru_cache(maxsize=None)
def _single_buffer_supported():
    """Probe whether this Pallas/Mosaic build honors pipeline_mode=pl.Buffered(1)."""
    if not hasattr(pl, "Buffered"):
        return False
    try:
        def _k(x_ref, o_ref):
            o_ref[...] = x_ref[...]

        probe = pl.pallas_call(
            _k,
            out_shape=jax.ShapeDtypeStruct((8, 128), jnp.float32),
            grid=(1,),
            in_specs=[pl.BlockSpec((8, 128), lambda i: (0, 0),
                                   pipeline_mode=pl.Buffered(1))],
            out_specs=pl.BlockSpec((8, 128), lambda i: (0, 0)),
        )
        jax.block_until_ready(probe(jnp.zeros((8, 128), jnp.float32)))
        return True
    except Exception:  # noqa: BLE001 - any failure -> keep default double buffering
        return False


def _invariant_spec(shape, index_map):
    """BlockSpec for a grid-invariant operand: single-buffered when supported (saves a full
    duplicate copy of the largest weights per kernel; no overlap lost, index_map is constant)."""
    if _single_buffer_supported():
        return pl.BlockSpec(shape, index_map, pipeline_mode=pl.Buffered(1))
    return pl.BlockSpec(shape, index_map)


def _pick_rows_per_block(n, t, d, d_in, vmem_budget, requested=None):
    """Largest divisor of n (<= 8) whose rough per-block VMEM footprint fits the budget."""
    if requested is not None:
        if n % requested != 0:
            raise ValueError(f"rows_per_block={requested} must divide batch size {n}")
        return requested
    per_row = (2 * (4 * t * d + 2 * t * d + 4 * t * t + 2 * t * d_in)   # pipelined in/out buffers
               + 12 * t * d + 8 * t * t)                                # in-kernel temporaries
    for cand in (8, 4, 2):
        if n % cand == 0 and cand * per_row <= vmem_budget // 2:
            return cand
    return 1


# ---------------------------------------------------------------- prediction module (in-kernel, lane-dense)
def _prediction(x, nx, nac, nfg, scores_ref, vid_ref, *, scale):
    """PredictionModule on a block of rows.

    Lane-dense layout: class scores are kept (B, C1, T) / (B, 1, T) so T sits on the 128-lane
    axis.  frm_scr^T + class-agnostic attention go out as ONE full-block (B, C1+1, T) store and
    the ca/cw video predictions as ONE (B, C1, 2) store (no masked partial stores).
    """
    bf16 = jnp.bfloat16
    nb = x.shape[0]
    nac16 = jnp.broadcast_to(nac.astype(bf16), (nb,) + nac.shape)    # (B, C1, D)
    nfg16 = jnp.broadcast_to(nfg.astype(bf16), (nb,) + nfg.shape)    # (B, 1, D)
    nx16 = nx.astype(bf16)
    x16 = x.astype(bf16)

    frm = _bdot_nt(nac16, nx16) * scale                  # (B, C1, T) f32 class scores
    fb = _bdot_nt(nfg16, nx16) * scale                   # (B, 1, T)
    att = jax.nn.sigmoid(fb)                             # class-agnostic attention (unnormalized)

    ws = jax.nn.sigmoid(frm)
    ws = ws / (jnp.sum(ws, axis=-1, keepdims=True) + EPS_ATT)        # normalize over T (lanes)
    wf = att / (jnp.sum(att, axis=-1, keepdims=True) + EPS_ATT)

    ca = _bdot(wf.astype(bf16), x16)                     # (B, 1, D)  attention-pooled feature
    cw = _bdot(ws.astype(bf16), x16)                     # (B, C1, D) class-wise pooled features

    ca_scr = jnp.sum(_l2norm(ca) * nac[None], axis=-1, keepdims=True) * scale   # (B, C1, 1) f32
    cw_scr = jnp.sum(_l2norm(cw) * nac[None], axis=-1, keepdims=True) * scale   # (B, C1, 1) f32

    scores_ref[...] = jnp.concatenate([frm, att], axis=1)                       # (B, C1+1, T)
    vid_ref[...] = jnp.concatenate(
        [_softmax(ca_scr, axis=1), _softmax(cw_scr, axis=1)], axis=-1)          # (B, C1, 2)


# ---------------------------------------------------------------- fused kernel A: embed + EM + RW-1 + pred(x) + mu-pred
def _fused_main_kernel(x_ref, w_ref, b_ref, mu0_ref, nac_ref, nfg_ref,
                       xe_ref, mu_ref, ieye_ref, y2x_ref, scores_ref, vid_ref, mupred_ref,
                       *, em_iter, w, scale):
    bf16 = jnp.bfloat16
    nb, t, d_in = x_ref.shape
    k, d = mu0_ref.shape
    c1 = nac_ref.shape[0]

    # ---- feature embedding over the whole row block at once (MXU sees M = B*T), + ReLU
    xe_flat = jnp.maximum(
        _dot(x_ref[...].reshape(nb * t, d_in), w_ref[...]) + b_ref[...], 0.0)   # (B*T, D) f32
    xe = xe_flat.reshape(nb, t, d)
    xe_ref[...] = xe

    x16 = xe.astype(bf16)
    norm_x = _l2norm(xe)
    nx16 = norm_x.astype(bf16)

    # ---- EM refinement of mu; latent scores kept (B, K, T) so T is on lanes
    mu = jnp.broadcast_to(mu0_ref[...][None], (nb, k, d))               # (B, K, D) f32
    for _ in range(em_iter):                   # em_iter is small & static -> unrolled
        nmu16 = _l2norm(mu).astype(bf16)
        lz = _softmax(_bdot_nt(nmu16, nx16) * 5.0, axis=1)              # (B, K, T)
        nlz = lz / (jnp.sum(lz, axis=-1, keepdims=True) + EPS_NORM)
        mu = _bdot(nlz.astype(bf16), x16)                               # (B, K, D) f32
    mu_ref[...] = mu

    # ---- random-walk stage 1 (lz in both (K,T) and (T,K) layouts -> MXU-canonical dots)
    nmu16 = _l2norm(mu).astype(bf16)
    lz_kt = _softmax(_bdot_nt(nmu16, nx16) * 5.0, axis=1)               # (B, K, T)
    nlz_kt16 = (lz_kt / (jnp.sum(lz_kt, axis=-1, keepdims=True) + EPS_NORM)).astype(bf16)
    # TODO(synk): if profiling ever shows the EUP (exp) slot binding, lz_tk can be an XLU
    # transpose of lz_kt instead of this recomputed softmax over the transposed logits.
    lz_tk16 = _softmax(_bdot_nt(nx16, nmu16) * 5.0, axis=-1).astype(bf16)   # (B, T, K), cast once
    aff = _bdot(lz_tk16, nlz_kt16)                                      # (B, T, T) f32
    # Emit (I - w^2 * A) directly: the wrapper only has to invert it (saves a full XLA pass).
    row = jax.lax.broadcasted_iota(jnp.int32, (t, t), 0)
    col = jax.lax.broadcasted_iota(jnp.int32, (t, t), 1)
    eye = (row == col).astype(jnp.float32)
    ieye_ref[...] = eye[None] - (w * w) * aff
    y2x = w * _bdot(lz_tk16, mu.astype(bf16)) + xe                      # (B, T, D) f32
    y2x_ref[...] = y2x.astype(bf16)                                     # bf16: halves A->B traffic

    # ---- prediction module on the embedded features (still resident in VMEM)
    _prediction(xe, norm_x, nac_ref[...], nfg_ref[...], scores_ref, vid_ref, scale=scale)

    # ---- mu classification scores (tiny; kept f32)
    mu_scr = _dot_nt(_l2norm(mu).reshape(nb * k, d), nac_ref[...]) * scale   # (B*K, C1)
    mupred_ref[...] = _softmax(mu_scr, axis=-1).reshape(nb, k, c1)


# ---------------------------------------------------------------- fused kernel B: RW stage-2 + pred(reallocated_x)
def _fused_realloc_kernel(inv_ref, y2x_ref, nac_ref, nfg_ref,
                          rx_ref, scores_ref, vid_ref, *, w, scale):
    # inv_ref / y2x_ref arrive in bf16 (cast in the wrapper / kernel A): the dominant
    # HBM->VMEM DMAs of this kernel are half-width.
    rx = (1.0 - w) * _bdot(inv_ref[...], y2x_ref[...])                  # (B, T, D) f32
    rx_ref[...] = rx
    _prediction(rx, _l2norm(rx), nac_ref[...], nfg_ref[...], scores_ref, vid_ref, scale=scale)


# ---------------------------------------------------------------- full forward
def wstal_forward(x, params, *, w, em_iter, scale_factor, rows_per_block=None):
    n, t, d_in = x.shape
    d = params["emb_w"].shape[1]
    k = params["mu"].shape[0]
    c1 = params["ac_center"].shape[0]

    vmem_limit = _vmem_limit_bytes()
    bs = _pick_rows_per_block(n, t, d, d_in, vmem_limit, rows_per_block)
    grid = (n // bs,)

    # TODO(synk): when grid has a single step on v7x (2 TCs/chip) a T-tile parallel axis on
    # kernel B would be needed to feed both cores; not implemented here.
    cparams = pltpu.CompilerParams(dimension_semantics=("parallel",),
                                   vmem_limit_bytes=vmem_limit)

    x16 = x.astype(jnp.bfloat16)
    w16 = params["emb_w"].astype(jnp.bfloat16)
    nac = _l2norm(params["ac_center"])        # grid-invariant: normalized once in XLA
    nfg = _l2norm(params["fg_center"])

    xe, mu, ieye_aff, y2x16, o_scores, o_vid, mu_pred = pl.pallas_call(
        functools.partial(_fused_main_kernel, em_iter=em_iter, w=w, scale=scale_factor),
        out_shape=(
            jax.ShapeDtypeStruct((n, t, d), jnp.float32),        # x_emb
            jax.ShapeDtypeStruct((n, k, d), jnp.float32),        # mu
            jax.ShapeDtypeStruct((n, t, t), jnp.float32),        # I - w^2 * affinity
            jax.ShapeDtypeStruct((n, t, d), jnp.bfloat16),       # y2x (consumed by kernel B)
            jax.ShapeDtypeStruct((n, c1 + 1, t), jnp.float32),   # packed frm_scr^T + attention
            jax.ShapeDtypeStruct((n, c1, 2), jnp.float32),       # packed ca/cw video preds
            jax.ShapeDtypeStruct((n, k, c1), jnp.float32),       # mu_pred
        ),
        grid_spec=pltpu.PrefetchScalarGridSpec(
            num_scalar_prefetch=0, grid=grid,
            in_specs=[
                pl.BlockSpec((bs, t, d_in), lambda i: (i, 0, 0)),
                _invariant_spec((d_in, d), lambda i: (0, 0)),
                _invariant_spec((1, d), lambda i: (0, 0)),
                _invariant_spec((k, d), lambda i: (0, 0)),
                _invariant_spec((c1, d), lambda i: (0, 0)),
                _invariant_spec((1, d), lambda i: (0, 0)),
            ],
            out_specs=(
                pl.BlockSpec((bs, t, d), lambda i: (i, 0, 0)),
                pl.BlockSpec((bs, k, d), lambda i: (i, 0, 0)),
                pl.BlockSpec((bs, t, t), lambda i: (i, 0, 0)),
                pl.BlockSpec((bs, t, d), lambda i: (i, 0, 0)),
                pl.BlockSpec((bs, c1 + 1, t), lambda i: (i, 0, 0)),
                pl.BlockSpec((bs, c1, 2), lambda i: (i, 0, 0)),
                pl.BlockSpec((bs, k, c1), lambda i: (i, 0, 0)),
            )),
        compiler_params=cparams,
    )(x16, w16, params["emb_b"], params["mu"], nac, nfg)

    # TODO(synk): the dense (T,T) inverse has no Pallas primitive; jnp.linalg.inv stays in XLA.
    # Kernel A already emitted (I - w^2 A); the inverse goes back to kernel B in bf16.
    mat_inv16 = jnp.linalg.inv(ieye_aff).astype(jnp.bfloat16)

    rx, m_scores, m_vid = pl.pallas_call(
        functools.partial(_fused_realloc_kernel, w=w, scale=scale_factor),
        out_shape=(
            jax.ShapeDtypeStruct((n, t, d), jnp.float32),        # reallocated_x
            jax.ShapeDtypeStruct((n, c1 + 1, t), jnp.float32),
            jax.ShapeDtypeStruct((n, c1, 2), jnp.float32),
        ),
        grid_spec=pltpu.PrefetchScalarGridSpec(
            num_scalar_prefetch=0, grid=grid,
            in_specs=[
                pl.BlockSpec((bs, t, t), lambda i: (i, 0, 0)),
                pl.BlockSpec((bs, t, d), lambda i: (i, 0, 0)),
                _invariant_spec((c1, d), lambda i: (0, 0)),
                _invariant_spec((1, d), lambda i: (0, 0)),
            ],
            out_specs=(
                pl.BlockSpec((bs, t, d), lambda i: (i, 0, 0)),
                pl.BlockSpec((bs, c1 + 1, t), lambda i: (i, 0, 0)),
                pl.BlockSpec((bs, c1, 2), lambda i: (i, 0, 0)),
            )),
        compiler_params=cparams,
    )(mat_inv16, y2x16, nac, nfg)

    def unpack(scores, vid):
        frm = jnp.swapaxes(scores[:, :c1, :], 1, 2)    # (N, T, C1)
        att = scores[:, c1, :]                         # (N, T)
        ca = vid[:, :, 0]                              # (N, C1)
        cw = vid[:, :, 1]                              # (N, C1)
        return [ca, cw, att, frm]

    o_out = unpack(o_scores, o_vid)
    m_out = unpack(m_scores, m_vid)
    # TODO(synk): nn.Dropout layers are identity (inference/eval mode); use_noise==2 path disabled.
    reallocated_x_drop = rx
    return o_out, m_out, [xe, mu, mu_pred, rx, reallocated_x_drop]


# ---------------------------------------------------------------- pure-JAX reference (same mixed precision)
def _ref_forward(x, params, *, w, em_iter, scale_factor):
    f32, bf16 = jnp.float32, jnp.bfloat16

    def l2(v):
        return v / (jnp.sqrt(jnp.sum(v * v, -1, keepdims=True)) + EPS_NORM)

    n, t, _ = x.shape
    xe = jnp.maximum(
        jnp.einsum('ntf,fd->ntd', x.astype(bf16), params["emb_w"].astype(bf16),
                   preferred_element_type=f32) + params["emb_b"], 0.0)

    x16 = xe.astype(bf16)
    nx16 = l2(xe).astype(bf16)
    mu = jnp.broadcast_to(params["mu"][None], (n,) + params["mu"].shape)
    for _ in range(em_iter):
        nmu16 = l2(mu).astype(bf16)
        lz = jax.nn.softmax(
            jnp.einsum('nkd,ntd->nkt', nmu16, nx16, preferred_element_type=f32) * 5.0, axis=1)
        nlz = lz / (jnp.sum(lz, -1, keepdims=True) + EPS_NORM)
        mu = jnp.einsum('nkt,ntd->nkd', nlz.astype(bf16), x16, preferred_element_type=f32)

    nmu16 = l2(mu).astype(bf16)
    lz = jax.nn.softmax(
        jnp.einsum('nkd,ntd->nkt', nmu16, nx16, preferred_element_type=f32) * 5.0, axis=1)
    nlz = lz / (jnp.sum(lz, -1, keepdims=True) + EPS_NORM)
    aff = jnp.einsum('nkt,nkd->ntd', lz.astype(bf16), nlz.astype(bf16),
                     preferred_element_type=f32)
    y2x = w * jnp.einsum('nkt,nkd->ntd', lz.astype(bf16), mu.astype(bf16),
                         preferred_element_type=f32) + xe
    mat_inv = jnp.linalg.inv(jnp.eye(t, dtype=f32)[None] - (w ** 2) * aff)
    rx = (1.0 - w) * jnp.einsum('ntk,nkd->ntd', mat_inv.astype(bf16), y2x.astype(bf16),
                                preferred_element_type=f32)

    nac = l2(params["ac_center"])
    nfg = l2(params["fg_center"])

    def pred(xx):
        nx = l2(xx).astype(bf16)
        xx16 = xx.astype(bf16)
        frm = jnp.einsum('ntd,cd->ntc', nx, nac.astype(bf16),
                         preferred_element_type=f32) * scale_factor
        fb = jnp.einsum('ntd,kd->ntk', nx, nfg.astype(bf16),
                        preferred_element_type=f32)[..., 0] * scale_factor
        att = jax.nn.sigmoid(fb)
        ws = jax.nn.sigmoid(frm)
        wf = jax.nn.sigmoid(fb)
        ws = ws / (jnp.sum(ws, axis=1, keepdims=True) + EPS_ATT)
        wf = wf / (jnp.sum(wf, axis=1, keepdims=True) + EPS_ATT)
        ca = jnp.einsum('ntd,nt->nd', xx16, wf.astype(bf16), preferred_element_type=f32)
        cw = jnp.einsum('ntd,ntc->ncd', xx16, ws.astype(bf16), preferred_element_type=f32)
        ca_scr = jnp.einsum('nd,cd->nc', l2(ca), nac) * scale_factor
        cw_scr = jnp.einsum('ncd,cd->nc', l2(cw), nac) * scale_factor
        return [jax.nn.softmax(ca_scr, -1), jax.nn.softmax(cw_scr, -1), att, frm]

    o, m = pred(xe), pred(rx)
    mu_pred = jax.nn.softmax(
        jnp.einsum('nkd,cd->nkc', l2(mu), nac) * scale_factor, -1)
    return o, m, [xe, mu, mu_pred, rx, rx]


# ---------------------------------------------------------------- main
if __name__ == "__main__":
    N, T = 2, 16
    N_IN, N_OUT = 32, 32
    N_MU, N_CLASS = 8, 4
    EM_ITER = 2
    W = 0.5
    SCALE = 20.0

    key = jax.random.PRNGKey(0)
    k1, k2, k3, k4 = jax.random.split(key, 4)

    def xavier(k, shape):
        bound = (6.0 / (shape[0] + shape[1])) ** 0.5
        return jax.random.uniform(k, shape, jnp.float32, -bound, bound)

    params = {
        "emb_w": xavier(k1, (N_IN, N_OUT)),           # Linear weight (stored in->out)
        "emb_b": jnp.zeros((1, N_OUT), jnp.float32),  # bias filled with 0 (weights_init_random)
        "mu": xavier(k2, (N_MU, N_OUT)),
        "ac_center": xavier(k3, (N_CLASS + 1, N_OUT)),
    }
    params["fg_center"] = -1.0 * params["ac_center"][-1:, :]

    x = jax.random.normal(k4, (N, T, N_IN), jnp.float32)

    out = wstal_forward(x, params, w=W, em_iter=EM_ITER, scale_factor=SCALE)
    jax.block_until_ready(out)

    ref = _ref_forward(x, params, w=W, em_iter=EM_ITER, scale_factor=SCALE)
    # Tolerance sized for bf16 mixed-precision matmuls (both paths use identical bf16 casting
    # points; residual differences come from accumulation order / transcendental rounding).
    for a, b in zip(jax.tree_util.tree_leaves(out), jax.tree_util.tree_leaves(ref)):
        assert a.shape == b.shape, (a.shape, b.shape)
        assert jnp.allclose(a, b, atol=2e-2, rtol=2e-2), float(jnp.max(jnp.abs(a - b)))

    print("KERNEL_OK")
</pallas_src>

<mosaic_0001>
module attributes {stable_mosaic.version = 11 : i64} {
  func.func @_k(%arg0: i32, %arg1: memref<8x128xf32, #tpu.memory_space<vmem>>, %arg2: memref<8x128xf32, #tpu.memory_space<vmem>>) attributes {dimension_semantics = [#tpu.dimension_semantics<arbitrary>], iteration_bounds = array<i64: 1>, scalar_prefetch = 0 : i64, scratch_operands = 0 : i64, tpu.core_type = #tpu.core_type<tc>, window_params = [{pipeline_mode = #tpu.pipeline_mode<synchronous>, transform_indices = @transform_0, window_bounds = array<i64: 8, 128>}, {pipeline_mode = #tpu.pipeline_mode<synchronous>, transform_indices = @transform_1, window_bounds = array<i64: 8, 128>}]} {
    %c0 = arith.constant 0 : index
    %c0_0 = arith.constant 0 : index
    %0 = vector.load %arg1[%c0, %c0_0] : memref<8x128xf32, #tpu.memory_space<vmem>>, vector<8x128xf32>
    %c0_1 = arith.constant 0 : index
    %c0_2 = arith.constant 0 : index
    %1 = vector.load %arg2[%c0_1, %c0_2] : memref<8x128xf32, #tpu.memory_space<vmem>>, vector<8x128xf32>
    tpu.vector_store %arg2[%c0_1, %c0_2], %0 {strides = array<i32>} : memref<8x128xf32, #tpu.memory_space<vmem>>, vector<8x128xf32>,
    return
  }
  func.func @transform_0(%arg0: i32) -> (i32, i32) {
    %c0_i32 = arith.constant 0 : i32
    %c0_i32_0 = arith.constant 0 : i32
    %c0_i32_1 = arith.constant 0 : i32
    return %c0_i32, %c0_i32_0 : i32, i32
  }
  func.func @transform_1(%arg0: i32) -> (i32, i32) {
    %c0_i32 = arith.constant 0 : i32
    %c0_i32_0 = arith.constant 0 : i32
    %c0_i32_1 = arith.constant 0 : i32
    return %c0_i32, %c0_i32_0 : i32, i32
  }
}

module attributes {stable_mosaic.version = 11 : i64} {
  func.func @_fused_main_kernel(%arg0: i32, %arg1: memref<2x16x32xbf16, #tpu.memory_space<vmem>>, %arg2: memref<32x32xbf16, #tpu.memory_space<vmem>>, %arg3: memref<1x32xf32, #tpu.memory_space<vmem>>, %arg4: memref<8x32xf32, #tpu.memory_space<vmem>>, %arg5: memref<5x32xf32, #tpu.memory_space<vmem>>, %arg6: memref<1x32xf32, #tpu.memory_space<vmem>>, %arg7: memref<2x16x32xf32, #tpu.memory_space<vmem>>, %arg8: memref<2x8x32xf32, #tpu.memory_space<vmem>>, %arg9: memref<2x16x16xf32, #tpu.memory_space<vmem>>, %arg10: memref<2x16x32xbf16, #tpu.memory_space<vmem>>, %arg11: memref<2x6x16xf32, #tpu.memory_space<vmem>>, %arg12: memref<2x5x2xf32, #tpu.memory_space<vmem>>, %arg13: memref<2x8x5xf32, #tpu.memory_space<vmem>>) attributes {dimension_semantics = [#tpu.dimension_semantics<parallel>], iteration_bounds = array<i64: 1>, scalar_prefetch = 0 : i64, scratch_operands = 0 : i64, tpu.core_type = #tpu.core_type<tc>, window_params = [{transform_indices = @transform_0, window_bounds = array<i64: 2, 16, 32>}, {pipeline_mode = #tpu.pipeline_mode<synchronous>, transform_indices = @transform_1, window_bounds = array<i64: 32, 32>}, {pipeline_mode = #tpu.pipeline_mode<synchronous>, transform_indices = @transform_2, window_bounds = array<i64: 1, 32>}, {pipeline_mode = #tpu.pipeline_mode<synchronous>, transform_indices = @transform_3, window_bounds = array<i64: 8, 32>}, {pipeline_mode = #tpu.pipeline_mode<synchronous>, transform_indices = @transform_4, window_bounds = array<i64: 5, 32>}, {pipeline_mode = #tpu.pipeline_mode<synchronous>, transform_indices = @transform_5, window_bounds = array<i64: 1, 32>}, {transform_indices = @transform_6, window_bounds = array<i64: 2, 16, 32>}, {transform_indices = @transform_7, window_bounds = array<i64: 2, 8, 32>}, {transform_indices = @transform_8, window_bounds = array<i64: 2, 16, 16>}, {transform_indices = @transform_9, window_bounds = array<i64: 2, 16, 32>}, {transform_indices = @transform_10, window_bounds = array<i64: 2, 6, 16>}, {transform_indices = @transform_11, window_bounds = array<i64: 2, 5, 2>}, {transform_indices = @transform_12, window_bounds = array<i64: 2, 8, 5>}]} {
    %c0 = arith.constant 0 : index
    %c0_0 = arith.constant 0 : index
    %c0_1 = arith.constant 0 : index
    %0 = vector.load %arg1[%c0, %c0_0, %c0_1] : memref<2x16x32xbf16, #tpu.memory_space<vmem>>, vector<2x16x32xbf16>
    %1 = vector.shape_cast %0 : vector<2x16x32xbf16> to vector<32x32xbf16>
    %c0_2 = arith.constant 0 : index
    %c0_3 = arith.constant 0 : index
    %2 = vector.load %arg2[%c0_2, %c0_3] : memref<32x32xbf16, #tpu.memory_space<vmem>>, vector<32x32xbf16>
    %cst = arith.constant dense<0.000000e+00> : vector<32x32xf32>
    %3 = tpu.matmul %1, %2, %cst {dimension_numbers = #tpu.dot_dimension_numbers<[1], [0], [0], [1], [0, 0, 1, 1], [], []>} : vector<32x32xbf16>, vector<32x32xbf16>, vector<32x32xf32> -> vector<32x32xf32>
    %c0_4 = arith.constant 0 : index
    %c0_5 = arith.constant 0 : index
    %4 = vector.load %arg3[%c0_4, %c0_5] : memref<1x32xf32, #tpu.memory_space<vmem>>, vector<1x32xf32>
    %5 = vector.broadcast %4 : vector<1x32xf32> to vector<32x32xf32>
    %6 = arith.addf %3, %5 : vector<32x32xf32>
    %cst_6 = arith.constant 0.000000e+00 : f32
    %7 = vector.broadcast %cst_6 : f32 to vector<32x32xf32>
    %8 = arith.maximumf %6, %7 : vector<32x32xf32>
    %9 = vector.shape_cast %8 : vector<32x32xf32> to vector<2x16x32xf32>
    %c0_7 = arith.constant 0 : index
    %c0_8 = arith.constant 0 : index
    %c0_9 = arith.constant 0 : index
    %10 = vector.load %arg7[%c0_7, %c0_8, %c0_9] : memref<2x16x32xf32, #tpu.memory_space<vmem>>, vector<2x16x32xf32>
    tpu.vector_store %arg7[%c0_7, %c0_8, %c0_9], %9 {strides = array<i32>} : memref<2x16x32xf32, #tpu.memory_space<vmem>>, vector<2x16x32xf32>,
    %11 = arith.truncf %9 : vector<2x16x32xf32> to vector<2x16x32xbf16>
    %12 = arith.mulf %9, %9 : vector<2x16x32xf32>
    %cst_10 = arith.constant dense<0.000000e+00> : vector<2x16xf32>
    %13 = vector.multi_reduction <add>, %12, %cst_10 [2] : vector<2x16x32xf32> to vector<2x16xf32>
    %14 = vector.shape_cast %13 : vector<2x16xf32> to vector<2x16x1xf32>
    %15 = math.sqrt %14 : vector<2x16x1xf32>
    %cst_11 = arith.constant 9.99999971E-10 : f32
    %16 = vector.broadcast %cst_11 : f32 to vector<2x16x1xf32>
    %17 = arith.addf %15, %16 : vector<2x16x1xf32>
    %18 = vector.broadcast %17 : vector<2x16x1xf32> to vector<2x16x32xf32>
    %19 = arith.divf %9, %18 : vector<2x16x32xf32>
    %20 = arith.truncf %19 : vector<2x16x32xf32> to vector<2x16x32xbf16>
    %c0_12 = arith.constant 0 : index
    %c0_13 = arith.constant 0 : index
    %21 = vector.load %arg4[%c0_12, %c0_13] : memref<8x32xf32, #tpu.memory_space<vmem>>, vector<8x32xf32>
    %22 = vector.shape_cast %21 : vector<8x32xf32> to vector<1x8x32xf32>
    %23 = vector.shape_cast %22 : vector<1x8x32xf32> to vector<1x8x32xf32>
    %24 = vector.broadcast %23 : vector<1x8x32xf32> to vector<2x8x32xf32>
    %25 = arith.mulf %24, %24 : vector<2x8x32xf32>
    %cst_14 = arith.constant dense<0.000000e+00> : vector<2x8xf32>
    %26 = vector.multi_reduction <add>, %25, %cst_14 [2] : vector<2x8x32xf32> to vector<2x8xf32>
    %27 = vector.shape_cast %26 : vector<2x8xf32> to vector<2x8x1xf32>
    %28 = math.sqrt %27 : vector<2x8x1xf32>
    %cst_15 = arith.constant 9.99999971E-10 : f32
    %29 = vector.broadcast %cst_15 : f32 to vector<2x8x1xf32>
    %30 = arith.addf %28, %29 : vector<2x8x1xf32>
    %31 = vector.broadcast %30 : vector<2x8x1xf32> to vector<2x8x32xf32>
    %32 = arith.divf %24, %31 : vector<2x8x32xf32>
    %33 = arith.truncf %32 : vector<2x8x32xf32> to vector<2x8x32xbf16>
    %cst_16 = arith.constant dense<0.000000e+00> : vector<2x8x16xf32>
    %34 = tpu.matmul %33, %20, %cst_16 {dimension_numbers = #tpu.dot_dimension_numbers<[2], [2], [1], [1], [0, 0, 0, 1, 1, 1], [0], [0]>} : vector<2x8x32xbf16>, vector<2x16x32xbf16>, vector<2x8x16xf32> -> vector<2x8x16xf32>
    %cst_17 = arith.constant 5.000000e+00 : f32
    %35 = vector.broadcast %cst_17 : f32 to vector<2x8x16xf32>
    %36 = arith.mulf %34, %35 : vector<2x8x16xf32>
    %cst_18 = arith.constant dense<0xFF800000> : vector<2x16xf32>
    %37 = vector.multi_reduction <maximumf>, %36, %cst_18 [1] : vector<2x8x16xf32> to vector<2x16xf32>
    %38 = vector.shape_cast %37 : vector<2x16xf32> to vector<2x1x16xf32>
    %39 = vector.broadcast %38 : vector<2x1x16xf32> to vector<2x8x16xf32>
    %40 = arith.subf %36, %39 : vector<2x8x16xf32>
    %41 = math.exp %40 : vector<2x8x16xf32>
    %cst_19 = arith.constant dense<0.000000e+00> : vector<2x16xf32>
    %42 = vector.multi_reduction <add>, %41, %cst_19 [1] : vector<2x8x16xf32> to vector<2x16xf32>
    %43 = vector.shape_cast %42 : vector<2x16xf32> to vector<2x1x16xf32>
    %44 = vector.broadcast %43 : vector<2x1x16xf32> to vector<2x8x16xf32>
    %45 = arith.divf %41, %44 : vector<2x8x16xf32>
    %cst_20 = arith.constant dense<0.000000e+00> : vector<2x8xf32>
    %46 = vector.multi_reduction <add>, %45, %cst_20 [2] : vector<2x8x16xf32> to vector<2x8xf32>
    %47 = vector.shape_cast %46 : vector<2x8xf32> to vector<2x8x1xf32>
    %cst_21 = arith.constant 9.99999971E-10 : f32
    %48 = vector.broadcast %cst_21 : f32 to vector<2x8x1xf32>
    %49 = arith.addf %47, %48 : vector<2x8x1xf32>
    %50 = vector.broadcast %49 : vector<2x8x1xf32> to vector<2x8x16xf32>
    %51 = arith.divf %45, %50 : vector<2x8x16xf32>
    %52 = arith.truncf %51 : vector<2x8x16xf32> to vector<2x8x16xbf16>
    %cst_22 = arith.constant dense<0.000000e+00> : vector<2x8x32xf32>
    %53 = tpu.matmul %52, %11, %cst_22 {dimension_numbers = #tpu.dot_dimension_numbers<[2], [1], [1], [2], [0, 0, 0, 1, 1, 2], [0], [0]>} : vector<2x8x16xbf16>, vector<2x16x32xbf16>, vector<2x8x32xf32> -> vector<2x8x32xf32>
    %54 = arith.mulf %53, %53 : vector<2x8x32xf32>
    %cst_23 = arith.constant dense<0.000000e+00> : vector<2x8xf32>
    %55 = vector.multi_reduction <add>, %54, %cst_23 [2] : vector<2x8x32xf32> to vector<2x8xf32>
    %56 = vector.shape_cast %55 : vector<2x8xf32> to vector<2x8x1xf32>
    %57 = math.sqrt %56 : vector<2x8x1xf32>
    %cst_24 = arith.constant 9.99999971E-10 : f32
    %58 = vector.broadcast %cst_24 : f32 to vector<2x8x1xf32>
    %59 = arith.addf %57, %58 : vector<2x8x1xf32>
    %60 = vector.broadcast %59 : vector<2x8x1xf32> to vector<2x8x32xf32>
    %61 = arith.divf %53, %60 : vector<2x8x32xf32>
    %62 = arith.truncf %61 : vector<2x8x32xf32> to vector<2x8x32xbf16>
    %cst_25 = arith.constant dense<0.000000e+00> : vector<2x8x16xf32>
    %63 = tpu.matmul %62, %20, %cst_25 {dimension_numbers = #tpu.dot_dimension_numbers<[2], [2], [1], [1], [0, 0, 0, 1, 1, 1], [0], [0]>} : vector<2x8x32xbf16>, vector<2x16x32xbf16>, vector<2x8x16xf32> -> vector<2x8x16xf32>
    %cst_26 = arith.constant 5.000000e+00 : f32
    %64 = vector.broadcast %cst_26 : f32 to vector<2x8x16xf32>
    %65 = arith.mulf %63, %64 : vector<2x8x16xf32>
    %cst_27 = arith.constant dense<0xFF800000> : vector<2x16xf32>
    %66 = vector.multi_reduction <maximumf>, %65, %cst_27 [1] : vector<2x8x16xf32> to vector<2x16xf32>
    %67 = vector.shape_cast %66 : vector<2x16xf32> to vector<2x1x16xf32>
    %68 = vector.broadcast %67 : vector<2x1x16xf32> to vector<2x8x16xf32>
    %69 = arith.subf %65, %68 : vector<2x8x16xf32>
    %70 = math.exp %69 : vector<2x8x16xf32>
    %cst_28 = arith.constant dense<0.000000e+00> : vector<2x16xf32>
    %71 = vector.multi_reduction <add>, %70, %cst_28 [1] : vector<2x8x16xf32> to vector<2x16xf32>
    %72 = vector.shape_cast %71 : vector<2x16xf32> to vector<2x1x16xf32>
    %73 = vector.broadcast %72 : vector<2x1x16xf32> to vector<2x8x16xf32>
    %74 = arith.divf %70, %73 : vector<2x8x16xf32>
    %cst_29 = arith.constant dense<0.000000e+00> : vector<2x8xf32>
    %75 = vector.multi_reduction <add>, %74, %cst_29 [2] : vector<2x8x16xf32> to vector<2x8xf32>
    %76 = vector.shape_cast %75 : vector<2x8xf32> to vector<2x8x1xf32>
    %cst_30 = arith.constant 9.99999971E-10 : f32
    %77 = vector.broadcast %cst_30 : f32 to vector<2x8x1xf32>
    %78 = arith.addf %76, %77 : vector<2x8x1xf32>
    %79 = vector.broadcast %78 : vector<2x8x1xf32> to vector<2x8x16xf32>
    %80 = arith.divf %74, %79 : vector<2x8x16xf32>
    %81 = arith.truncf %80 : vector<2x8x16xf32> to vector<2x8x16xbf16>
    %cst_31 = arith.constant dense<0.000000e+00> : vector<2x8x32xf32>
    %82 = tpu.matmul %81, %11, %cst_31 {dimension_numbers = #tpu.dot_dimension_numbers<[2], [1], [1], [2], [0, 0, 0, 1, 1, 2], [0], [0]>} : vector<2x8x16xbf16>, vector<2x16x32xbf16>, vector<2x8x32xf32> -> vector<2x8x32xf32>
    %c0_32 = arith.constant 0 : index
    %c0_33 = arith.constant 0 : index
    %c0_34 = arith.constant 0 : index
    %83 = vector.load %arg8[%c0_32, %c0_33, %c0_34] : memref<2x8x32xf32, #tpu.memory_space<vmem>>, vector<2x8x32xf32>
    tpu.vector_store %arg8[%c0_32, %c0_33, %c0_34], %82 {strides = array<i32>} : memref<2x8x32xf32, #tpu.memory_space<vmem>>, vector<2x8x32xf32>,
    %84 = arith.mulf %82, %82 : vector<2x8x32xf32>
    %cst_35 = arith.constant dense<0.000000e+00> : vector<2x8xf32>
    %85 = vector.multi_reduction <add>, %84, %cst_35 [2] : vector<2x8x32xf32> to vector<2x8xf32>
    %86 = vector.shape_cast %85 : vector<2x8xf32> to vector<2x8x1xf32>
    %87 = math.sqrt %86 : vector<2x8x1xf32>
    %cst_36 = arith.constant 9.99999971E-10 : f32
    %88 = vector.broadcast %cst_36 : f32 to vector<2x8x1xf32>
    %89 = arith.addf %87, %88 : vector<2x8x1xf32>
    %90 = vector.broadcast %89 : vector<2x8x1xf32> to vector<2x8x32xf32>
    %91 = arith.divf %82, %90 : vector<2x8x32xf32>
    %92 = arith.truncf %91 : vector<2x8x32xf32> to vector<2x8x32xbf16>
    %cst_37 = arith.constant dense<0.000000e+00> : vector<2x8x16xf32>
    %93 = tpu.matmul %92, %20, %cst_37 {dimension_numbers = #tpu.dot_dimension_numbers<[2], [2], [1], [1], [0, 0, 0, 1, 1, 1], [0], [0]>} : vector<2x8x32xbf16>, vector<2x16x32xbf16>, vector<2x8x16xf32> -> vector<2x8x16xf32>
    %cst_38 = arith.constant 5.000000e+00 : f32
    %94 = vector.broadcast %cst_38 : f32 to vector<2x8x16xf32>
    %95 = arith.mulf %93, %94 : vector<2x8x16xf32>
    %cst_39 = arith.constant dense<0xFF800000> : vector<2x16xf32>
    %96 = vector.multi_reduction <maximumf>, %95, %cst_39 [1] : vector<2x8x16xf32> to vector<2x16xf32>
    %97 = vector.shape_cast %96 : vector<2x16xf32> to vector<2x1x16xf32>
    %98 = vector.broadcast %97 : vector<2x1x16xf32> to vector<2x8x16xf32>
    %99 = arith.subf %95, %98 : vector<2x8x16xf32>
    %100 = math.exp %99 : vector<2x8x16xf32>
    %cst_40 = arith.constant dense<0.000000e+00> : vector<2x16xf32>
    %101 = vector.multi_reduction <add>, %100, %cst_40 [1] : vector<2x8x16xf32> to vector<2x16xf32>
    %102 = vector.shape_cast %101 : vector<2x16xf32> to vector<2x1x16xf32>
    %103 = vector.broadcast %102 : vector<2x1x16xf32> to vector<2x8x16xf32>
    %104 = arith.divf %100, %103 : vector<2x8x16xf32>
    %cst_41 = arith.constant dense<0.000000e+00> : vector<2x8xf32>
    %105 = vector.multi_reduction <add>, %104, %cst_41 [2] : vector<2x8x16xf32> to vector<2x8xf32>
    %106 = vector.shape_cast %105 : vector<2x8xf32> to vector<2x8x1xf32>
    %cst_42 = arith.constant 9.99999971E-10 : f32
    %107 = vector.broadcast %cst_42 : f32 to vector<2x8x1xf32>
    %108 = arith.addf %106, %107 : vector<2x8x1xf32>
    %109 = vector.broadcast %108 : vector<2x8x1xf32> to vector<2x8x16xf32>
    %110 = arith.divf %104, %109 : vector<2x8x16xf32>
    %111 = arith.truncf %110 : vector<2x8x16xf32> to vector<2x8x16xbf16>
    %cst_43 = arith.constant dense<0.000000e+00> : vector<2x16x8xf32>
    %112 = tpu.matmul %20, %92, %cst_43 {dimension_numbers = #tpu.dot_dimension_numbers<[2], [2], [1], [1], [0, 0, 0, 1, 1, 1], [0], [0]>} : vector<2x16x32xbf16>, vector<2x8x32xbf16>, vector<2x16x8xf32> -> vector<2x16x8xf32>
    %cst_44 = arith.constant 5.000000e+00 : f32
    %113 = vector.broadcast %cst_44 : f32 to vector<2x16x8xf32>
    %114 = arith.mulf %112, %113 : vector<2x16x8xf32>
    %cst_45 = arith.constant dense<0xFF800000> : vector<2x16xf32>
    %115 = vector.multi_reduction <maximumf>, %114, %cst_45 [2] : vector<2x16x8xf32> to vector<2x16xf32>
    %116 = vector.shape_cast %115 : vector<2x16xf32> to vector<2x16x1xf32>
    %117 = vector.broadcast %116 : vector<2x16x1xf32> to vector<2x16x8xf32>
    %118 = arith.subf %114, %117 : vector<2x16x8xf32>
    %119 = math.exp %118 : vector<2x16x8xf32>
    %cst_46 = arith.constant dense<0.000000e+00> : vector<2x16xf32>
    %120 = vector.multi_reduction <add>, %119, %cst_46 [2] : vector<2x16x8xf32> to vector<2x16xf32>
    %121 = vector.shape_cast %120 : vector<2x16xf32> to vector<2x16x1xf32>
    %122 = vector.broadcast %121 : vector<2x16x1xf32> to vector<2x16x8xf32>
    %123 = arith.divf %119, %122 : vector<2x16x8xf32>
    %124 = arith.truncf %123 : vector<2x16x8xf32> to vector<2x16x8xbf16>
    %cst_47 = arith.constant dense<0.000000e+00> : vector<2x16x16xf32>
    %125 = tpu.matmul %124, %111, %cst_47 {dimension_numbers = #tpu.dot_dimension_numbers<[2], [1], [1], [2], [0, 0, 0, 1, 1, 2], [0], [0]>} : vector<2x16x8xbf16>, vector<2x8x16xbf16>, vector<2x16x16xf32> -> vector<2x16x16xf32>
    %126 = tpu.iota {dimensions = array<i32: 0>} : vector<16x16xi32>
    %127 = tpu.iota {dimensions = array<i32: 1>} : vector<16x16xi32>
    %128 = arith.cmpi eq, %126, %127 : vector<16x16xi32>
    %129 = arith.extui %128 : vector<16x16xi1> to vector<16x16xi32>
    %130 = arith.sitofp %129 : vector<16x16xi32> to vector<16x16xf32>
    %131 = vector.shape_cast %130 : vector<16x16xf32> to vector<1x16x16xf32>
    %cst_48 = arith.constant 2.500000e-01 : f32
    %132 = vector.broadcast %cst_48 : f32 to vector<2x16x16xf32>
    %133 = arith.mulf %132, %125 : vector<2x16x16xf32>
    %134 = vector.broadcast %131 : vector<1x16x16xf32> to vector<2x16x16xf32>
    %135 = arith.subf %134, %133 : vector<2x16x16xf32>
    %c0_49 = arith.constant 0 : index
    %c0_50 = arith.constant 0 : index
    %c0_51 = arith.constant 0 : index
    %136 = vector.load %arg9[%c0_49, %c0_50, %c0_51] : memref<2x16x16xf32, #tpu.memory_space<vmem>>, vector<2x16x16xf32>
    tpu.vector_store %arg9[%c0_49, %c0_50, %c0_51], %135 {strides = array<i32>} : memref<2x16x16xf32, #tpu.memory_space<vmem>>, vector<2x16x16xf32>,
    %137 = arith.truncf %82 : vector<2x8x32xf32> to vector<2x8x32xbf16>
    %cst_52 = arith.constant dense<0.000000e+00> : vector<2x16x32xf32>
    %138 = tpu.matmul %124, %137, %cst_52 {dimension_numbers = #tpu.dot_dimension_numbers<[2], [1], [1], [2], [0, 0, 0, 1, 1, 2], [0], [0]>} : vector<2x16x8xbf16>, vector<2x8x32xbf16>, vector<2x16x32xf32> -> vector<2x16x32xf32>
    %cst_53 = arith.constant 5.000000e-01 : f32
    %139 = vector.broadcast %cst_53 : f32 to vector<2x16x32xf32>
    %140 = arith.mulf %139, %138 : vector<2x16x32xf32>
    %141 = arith.addf %140, %9 : vector<2x16x32xf32>
    %142 = arith.truncf %141 : vector<2x16x32xf32> to vector<2x16x32xbf16>
    %c0_54 = arith.constant 0 : index
    %c0_55 = arith.constant 0 : index
    %c0_56 = arith.constant 0 : index
    %143 = vector.load %arg10[%c0_54, %c0_55, %c0_56] : memref<2x16x32xbf16, #tpu.memory_space<vmem>>, vector<2x16x32xbf16>
    tpu.vector_store %arg10[%c0_54, %c0_55, %c0_56], %142 {strides = array<i32>} : memref<2x16x32xbf16, #tpu.memory_space<vmem>>, vector<2x16x32xbf16>,
    %c0_57 = arith.constant 0 : index
    %c0_58 = arith.constant 0 : index
    %144 = vector.load %arg5[%c0_57, %c0_58] : memref<5x32xf32, #tpu.memory_space<vmem>>, vector<5x32xf32>
    %c0_59 = arith.constant 0 : index
    %c0_60 = arith.constant 0 : index
    %145 = vector.load %arg6[%c0_59, %c0_60] : memref<1x32xf32, #tpu.memory_space<vmem>>, vector<1x32xf32>
    %146 = arith.truncf %144 : vector<5x32xf32> to vector<5x32xbf16>
    %147 = vector.shape_cast %146 : vector<5x32xbf16> to vector<1x5x32xbf16>
    %148 = vector.broadcast %147 : vector<1x5x32xbf16> to vector<2x5x32xbf16>
    %149 = arith.truncf %145 : vector<1x32xf32> to vector<1x32xbf16>
    %150 = vector.shape_cast %149 : vector<1x32xbf16> to vector<1x1x32xbf16>
    %151 = vector.broadcast %150 : vector<1x1x32xbf16> to vector<2x1x32xbf16>
    %152 = arith.truncf %19 : vector<2x16x32xf32> to vector<2x16x32xbf16>
    %153 = arith.truncf %9 : vector<2x16x32xf32> to vector<2x16x32xbf16>
    %cst_61 = arith.constant dense<0.000000e+00> : vector<2x5x16xf32>
    %154 = tpu.matmul %148, %152, %cst_61 {dimension_numbers = #tpu.dot_dimension_numbers<[2], [2], [1], [1], [0, 0, 0, 1, 1, 1], [0], [0]>} : vector<2x5x32xbf16>, vector<2x16x32xbf16>, vector<2x5x16xf32> -> vector<2x5x16xf32>
    %cst_62 = arith.constant 2.000000e+01 : f32
    %155 = vector.broadcast %cst_62 : f32 to vector<2x5x16xf32>
    %156 = arith.mulf %154, %155 : vector<2x5x16xf32>
    %cst_63 = arith.constant dense<0.000000e+00> : vector<2x1x16xf32>
    %157 = tpu.matmul %151, %152, %cst_63 {dimension_numbers = #tpu.dot_dimension_numbers<[2], [2], [1], [1], [0, 0, 0, 1, 1, 1], [0], [0]>} : vector<2x1x32xbf16>, vector<2x16x32xbf16>, vector<2x1x16xf32> -> vector<2x1x16xf32>
    %cst_64 = arith.constant 2.000000e+01 : f32
    %158 = vector.broadcast %cst_64 : f32 to vector<2x1x16xf32>
    %159 = arith.mulf %157, %158 : vector<2x1x16xf32>
    %160 = arith.negf %159 : vector<2x1x16xf32>
    %161 = math.exp %160 : vector<2x1x16xf32>
    %cst_65 = arith.constant 1.000000e+00 : f32
    %162 = vector.broadcast %cst_65 : f32 to vector<2x1x16xf32>
    %163 = arith.addf %162, %161 : vector<2x1x16xf32>
    %164 = arith.divf %162, %163 : vector<2x1x16xf32>
    %165 = arith.negf %156 : vector<2x5x16xf32>
    %166 = math.exp %165 : vector<2x5x16xf32>
    %cst_66 = arith.constant 1.000000e+00 : f32
    %167 = vector.broadcast %cst_66 : f32 to vector<2x5x16xf32>
    %168 = arith.addf %167, %166 : vector<2x5x16xf32>
    %169 = arith.divf %167, %168 : vector<2x5x16xf32>
    %cst_67 = arith.constant dense<0.000000e+00> : vector<2x5xf32>
    %170 = vector.multi_reduction <add>, %169, %cst_67 [2] : vector<2x5x16xf32> to vector<2x5xf32>
    %171 = vector.shape_cast %170 : vector<2x5xf32> to vector<2x5x1xf32>
    %cst_68 = arith.constant 9.99999974E-6 : f32
    %172 = vector.broadcast %cst_68 : f32 to vector<2x5x1xf32>
    %173 = arith.addf %171, %172 : vector<2x5x1xf32>
    %174 = vector.broadcast %173 : vector<2x5x1xf32> to vector<2x5x16xf32>
    %175 = arith.divf %169, %174 : vector<2x5x16xf32>
    %cst_69 = arith.constant dense<0.000000e+00> : vector<2x1xf32>
    %176 = vector.multi_reduction <add>, %164, %cst_69 [2] : vector<2x1x16xf32> to vector<2x1xf32>
    %177 = vector.shape_cast %176 : vector<2x1xf32> to vector<2x1x1xf32>
    %cst_70 = arith.constant 9.99999974E-6 : f32
    %178 = vector.broadcast %cst_70 : f32 to vector<2x1x1xf32>
    %179 = arith.addf %177, %178 : vector<2x1x1xf32>
    %180 = vector.broadcast %179 : vector<2x1x1xf32> to vector<2x1x16xf32>
    %181 = arith.divf %164, %180 : vector<2x1x16xf32>
    %182 = arith.truncf %181 : vector<2x1x16xf32> to vector<2x1x16xbf16>
    %cst_71 = arith.constant dense<0.000000e+00> : vector<2x1x32xf32>
    %183 = tpu.matmul %182, %153, %cst_71 {dimension_numbers = #tpu.dot_dimension_numbers<[2], [1], [1], [2], [0, 0, 0, 1, 1, 2], [0], [0]>} : vector<2x1x16xbf16>, vector<2x16x32xbf16>, vector<2x1x32xf32> -> vector<2x1x32xf32>
    %184 = arith.truncf %175 : vector<2x5x16xf32> to vector<2x5x16xbf16>
    %cst_72 = arith.constant dense<0.000000e+00> : vector<2x5x32xf32>
    %185 = tpu.matmul %184, %153, %cst_72 {dimension_numbers = #tpu.dot_dimension_numbers<[2], [1], [1], [2], [0, 0, 0, 1, 1, 2], [0], [0]>} : vector<2x5x16xbf16>, vector<2x16x32xbf16>, vector<2x5x32xf32> -> vector<2x5x32xf32>
    %186 = arith.mulf %183, %183 : vector<2x1x32xf32>
    %cst_73 = arith.constant dense<0.000000e+00> : vector<2x1xf32>
    %187 = vector.multi_reduction <add>, %186, %cst_73 [2] : vector<2x1x32xf32> to vector<2x1xf32>
    %188 = vector.shape_cast %187 : vector<2x1xf32> to vector<2x1x1xf32>
    %189 = math.sqrt %188 : vector<2x1x1xf32>
    %cst_74 = arith.constant 9.99999971E-10 : f32
    %190 = vector.broadcast %cst_74 : f32 to vector<2x1x1xf32>
    %191 = arith.addf %189, %190 : vector<2x1x1xf32>
    %192 = vector.broadcast %191 : vector<2x1x1xf32> to vector<2x1x32xf32>
    %193 = arith.divf %183, %192 : vector<2x1x32xf32>
    %194 = vector.shape_cast %144 : vector<5x32xf32> to vector<1x5x32xf32>
    %195 = vector.broadcast %193 : vector<2x1x32xf32> to vector<2x5x32xf32>
    %196 = vector.broadcast %194 : vector<1x5x32xf32> to vector<2x5x32xf32>
    %197 = arith.mulf %195, %196 : vector<2x5x32xf32>
    %cst_75 = arith.constant dense<0.000000e+00> : vector<2x5xf32>
    %198 = vector.multi_reduction <add>, %197, %cst_75 [2] : vector<2x5x32xf32> to vector<2x5xf32>
    %199 = vector.shape_cast %198 : vector<2x5xf32> to vector<2x5x1xf32>
    %cst_76 = arith.constant 2.000000e+01 : f32
    %200 = vector.broadcast %cst_76 : f32 to vector<2x5x1xf32>
    %201 = arith.mulf %199, %200 : vector<2x5x1xf32>
    %202 = arith.mulf %185, %185 : vector<2x5x32xf32>
    %cst_77 = arith.constant dense<0.000000e+00> : vector<2x5xf32>
    %203 = vector.multi_reduction <add>, %202, %cst_77 [2] : vector<2x5x32xf32> to vector<2x5xf32>
    %204 = vector.shape_cast %203 : vector<2x5xf32> to vector<2x5x1xf32>
    %205 = math.sqrt %204 : vector<2x5x1xf32>
    %cst_78 = arith.constant 9.99999971E-10 : f32
    %206 = vector.broadcast %cst_78 : f32 to vector<2x5x1xf32>
    %207 = arith.addf %205, %206 : vector<2x5x1xf32>
    %208 = vector.broadcast %207 : vector<2x5x1xf32> to vector<2x5x32xf32>
    %209 = arith.divf %185, %208 : vector<2x5x32xf32>
    %210 = vector.shape_cast %144 : vector<5x32xf32> to vector<1x5x32xf32>
    %211 = vector.broadcast %210 : vector<1x5x32xf32> to vector<2x5x32xf32>
    %212 = arith.mulf %209, %211 : vector<2x5x32xf32>
    %cst_79 = arith.constant dense<0.000000e+00> : vector<2x5xf32>
    %213 = vector.multi_reduction <add>, %212, %cst_79 [2] : vector<2x5x32xf32> to vector<2x5xf32>
    %214 = vector.shape_cast %213 : vector<2x5xf32> to vector<2x5x1xf32>
    %cst_80 = arith.constant 2.000000e+01 : f32
    %215 = vector.broadcast %cst_80 : f32 to vector<2x5x1xf32>
    %216 = arith.mulf %214, %215 : vector<2x5x1xf32>
    %217 = tpu.concatenate %156, %164 in 1 : vector<2x5x16xf32>, vector<2x1x16xf32> -> vector<2x6x16xf32>
    %c0_81 = arith.constant 0 : index
    %c0_82 = arith.constant 0 : index
    %c0_83 = arith.constant 0 : index
    %218 = vector.load %arg11[%c0_81, %c0_82, %c0_83] : memref<2x6x16xf32, #tpu.memory_space<vmem>>, vector<2x6x16xf32>
    tpu.vector_store %arg11[%c0_81, %c0_82, %c0_83], %217 {strides = array<i32>} : memref<2x6x16xf32, #tpu.memory_space<vmem>>, vector<2x6x16xf32>,
    %cst_84 = arith.constant dense<0xFF800000> : vector<2x1xf32>
    %219 = vector.multi_reduction <maximumf>, %201, %cst_84 [1] : vector<2x5x1xf32> to vector<2x1xf32>
    %220 = vector.shape_cast %219 : vector<2x1xf32> to vector<2x1x1xf32>
    %221 = vector.broadcast %220 : vector<2x1x1xf32> to vector<2x5x1xf32>
    %222 = arith.subf %201, %221 : vector<2x5x1xf32>
    %223 = math.exp %222 : vector<2x5x1xf32>
    %cst_85 = arith.constant dense<0.000000e+00> : vector<2x1xf32>
    %224 = vector.multi_reduction <add>, %223, %cst_85 [1] : vector<2x5x1xf32> to vector<2x1xf32>
    %225 = vector.shape_cast %224 : vector<2x1xf32> to vector<2x1x1xf32>
    %226 = vector.broadcast %225 : vector<2x1x1xf32> to vector<2x5x1xf32>
    %227 = arith.divf %223, %226 : vector<2x5x1xf32>
    %cst_86 = arith.constant dense<0xFF800000> : vector<2x1xf32>
    %228 = vector.multi_reduction <maximumf>, %216, %cst_86 [1] : vector<2x5x1xf32> to vector<2x1xf32>
    %229 = vector.shape_cast %228 : vector<2x1xf32> to vector<2x1x1xf32>
    %230 = vector.broadcast %229 : vector<2x1x1xf32> to vector<2x5x1xf32>
    %231 = arith.subf %216, %230 : vector<2x5x1xf32>
    %232 = math.exp %231 : vector<2x5x1xf32>
    %cst_87 = arith.constant dense<0.000000e+00> : vector<2x1xf32>
    %233 = vector.multi_reduction <add>, %232, %cst_87 [1] : vector<2x5x1xf32> to vector<2x1xf32>
    %234 = vector.shape_cast %233 : vector<2x1xf32> to vector<2x1x1xf32>
    %235 = vector.broadcast %234 : vector<2x1x1xf32> to vector<2x5x1xf32>
    %236 = arith.divf %232, %235 : vector<2x5x1xf32>
    %237 = tpu.concatenate %227, %236 in 2 : vector<2x5x1xf32>, vector<2x5x1xf32> -> vector<2x5x2xf32>
    %c0_88 = arith.constant 0 : index
    %c0_89 = arith.constant 0 : index
    %c0_90 = arith.constant 0 : index
    %238 = vector.load %arg12[%c0_88, %c0_89, %c0_90] : memref<2x5x2xf32, #tpu.memory_space<vmem>>, vector<2x5x2xf32>
    tpu.vector_store %arg12[%c0_88, %c0_89, %c0_90], %237 {strides = array<i32>} : memref<2x5x2xf32, #tpu.memory_space<vmem>>, vector<2x5x2xf32>,
    %239 = arith.mulf %82, %82 : vector<2x8x32xf32>
    %cst_91 = arith.constant dense<0.000000e+00> : vector<2x8xf32>
    %240 = vector.multi_reduction <add>, %239, %cst_91 [2] : vector<2x8x32xf32> to vector<2x8xf32>
    %241 = vector.shape_cast %240 : vector<2x8xf32> to vector<2x8x1xf32>
    %242 = math.sqrt %241 : vector<2x8x1xf32>
    %cst_92 = arith.constant 9.99999971E-10 : f32
    %243 = vector.broadcast %cst_92 : f32 to vector<2x8x1xf32>
    %244 = arith.addf %242, %243 : vector<2x8x1xf32>
    %245 = vector.broadcast %244 : vector<2x8x1xf32> to vector<2x8x32xf32>
    %246 = arith.divf %82, %245 : vector<2x8x32xf32>
    %247 = vector.shape_cast %246 : vector<2x8x32xf32> to vector<16x32xf32>
    %c0_93 = arith.constant 0 : index
    %c0_94 = arith.constant 0 : index
    %248 = vector.load %arg5[%c0_93, %c0_94] : memref<5x32xf32, #tpu.memory_space<vmem>>, vector<5x32xf32>
    %cst_95 = arith.constant dense<0.000000e+00> : vector<16x5xf32>
    %249 = tpu.matmul %247, %248, %cst_95 {dimension_numbers = #tpu.dot_dimension_numbers<[1], [1], [0], [0], [0, 0, 1, 0], [], []>} : vector<16x32xf32>, vector<5x32xf32>, vector<16x5xf32> -> vector<16x5xf32>
    %cst_96 = arith.constant 2.000000e+01 : f32
    %250 = vector.broadcast %cst_96 : f32 to vector<16x5xf32>
    %251 = arith.mulf %249, %250 : vector<16x5xf32>
    %cst_97 = arith.constant dense<0xFF800000> : vector<16xf32>
    %252 = vector.multi_reduction <maximumf>, %251, %cst_97 [1] : vector<16x5xf32> to vector<16xf32>
    %253 = vector.shape_cast %252 : vector<16xf32> to vector<16x1xf32>
    %254 = vector.broadcast %253 : vector<16x1xf32> to vector<16x5xf32>
    %255 = arith.subf %251, %254 : vector<16x5xf32>
    %256 = math.exp %255 : vector<16x5xf32>
    %cst_98 = arith.constant dense<0.000000e+00> : vector<16xf32>
    %257 = vector.multi_reduction <add>, %256, %cst_98 [1] : vector<16x5xf32> to vector<16xf32>
    %258 = vector.shape_cast %257 : vector<16xf32> to vector<16x1xf32>
    %259 = vector.broadcast %258 : vector<16x1xf32> to vector<16x5xf32>
    %260 = arith.divf %256, %259 : vector<16x5xf32>
    %261 = vector.shape_cast %260 : vector<16x5xf32> to vector<2x8x5xf32>
    %c0_99 = arith.constant 0 : index
    %c0_100 = arith.constant 0 : index
    %c0_101 = arith.constant 0 : index
    %262 = vector.load %arg13[%c0_99, %c0_100, %c0_101] : memref<2x8x5xf32, #tpu.memory_space<vmem>>, vector<2x8x5xf32>
    tpu.vector_store %arg13[%c0_99, %c0_100, %c0_101], %261 {strides = array<i32>} : memref<2x8x5xf32, #tpu.memory_space<vmem>>, vector<2x8x5xf32>,
    return
  }
  func.func @transform_0(%arg0: i32) -> (i32, i32, i32) {
    %c0_i32 = arith.constant 0 : i32
    %c0_i32_0 = arith.constant 0 : i32
    %c0_i32_1 = arith.constant 0 : i32
    return %arg0, %c0_i32, %c0_i32_0 : i32, i32, i32
  }
  func.func @transform_1(%arg0: i32) -> (i32, i32) {
    %c0_i32 = arith.constant 0 : i32
    %c0_i32_0 = arith.constant 0 : i32
    %c0_i32_1 = arith.constant 0 : i32
    return %c0_i32, %c0_i32_0 : i32, i32
  }
  func.func @transform_2(%arg0: i32) -> (i32, i32) {
    %c0_i32 = arith.constant 0 : i32
    %c0_i32_0 = arith.constant 0 : i32
    %c0_i32_1 = arith.constant 0 : i32
    return %c0_i32, %c0_i32_0 : i32, i32
  }
  func.func @transform_3(%arg0: i32) -> (i32, i32) {
    %c0_i32 = arith.constant 0 : i32
    %c0_i32_0 = arith.constant 0 : i32
    %c0_i32_1 = arith.constant 0 : i32
    return %c0_i32, %c0_i32_0 : i32, i32
  }
  func.func @transform_4(%arg0: i32) -> (i32, i32) {
    %c0_i32 = arith.constant 0 : i32
    %c0_i32_0 = arith.constant 0 : i32
    %c0_i32_1 = arith.constant 0 : i32
    return %c0_i32, %c0_i32_0 : i32, i32
  }
  func.func @transform_5(%arg0: i32) -> (i32, i32) {
    %c0_i32 = arith.constant 0 : i32
    %c0_i32_0 = arith.constant 0 : i32
    %c0_i32_1 = arith.constant 0 : i32
    return %c0_i32, %c0_i32_0 : i32, i32
  }
  func.func @transform_6(%arg0: i32) -> (i32, i32, i32) {
    %c0_i32 = arith.constant 0 : i32
    %c0_i32_0 = arith.constant 0 : i32
    %c0_i32_1 = arith.constant 0 : i32
    return %arg0, %c0_i32, %c0_i32_0 : i32, i32, i32
  }
  func.func @transform_7(%arg0: i32) -> (i32, i32, i32) {
    %c0_i32 = arith.constant 0 : i32
    %c0_i32_0 = arith.constant 0 : i32
    %c0_i32_1 = arith.constant 0 : i32
    return %arg0, %c0_i32, %c0_i32_0 : i32, i32, i32
  }
  func.func @transform_8(%arg0: i32) -> (i32, i32, i32) {
    %c0_i32 = arith.constant 0 : i32
    %c0_i32_0 = arith.constant 0 : i32
    %c0_i32_1 = arith.constant 0 : i32
    return %arg0, %c0_i32, %c0_i32_0 : i32, i32, i32
  }
  func.func @transform_9(%arg0: i32) -> (i32, i32, i32) {
    %c0_i32 = arith.constant 0 : i32
    %c0_i32_0 = arith.constant 0 : i32
    %c0_i32_1 = arith.constant 0 : i32
    return %arg0, %c0_i32, %c0_i32_0 : i32, i32, i32
  }
  func.func @transform_10(%arg0: i32) -> (i32, i32, i32) {
    %c0_i32 = arith.constant 0 : i32
    %c0_i32_0 = arith.constant 0 : i32
    %c0_i32_1 = arith.constant 0 : i32
    return %arg0, %c0_i32, %c0_i32_0 : i32, i32, i32
  }
  func.func @transform_11(%arg0: i32) -> (i32, i32, i32) {
    %c0_i32 = arith.constant 0 : i32
    %c0_i32_0 = arith.constant 0 : i32
    %c0_i32_1 = arith.constant 0 : i32
    return %arg0, %c0_i32, %c0_i32_0 : i32, i32, i32
  }
  func.func @transform_12(%arg0: i32) -> (i32, i32, i32) {
    %c0_i32 = arith.constant 0 : i32
    %c0_i32_0 = arith.constant 0 : i32
    %c0_i32_1 = arith.constant 0 : i32
    return %arg0, %c0_i32, %c0_i32_0 : i32, i32, i32
  }
}

</mosaic_0001>

<bundles_post_ra>
// kernel: tpu_custom_call.1
= control target key start
LH: loop header
LB: loop body
LE: loop exit
PB: predicated region body
PF: predicated region fallthrough
CT: control target
= control target key end

     0   :  { %6 = vsyncpa [#allocation3], 0  ;;  %s124_s0 = inlined_call_operand.hbm [shape: f32[8,128], index: 0, kind: input, shape index: {}]   ;;  %s125_s1 = inlined_call_operand.hbm [shape: f32[8,128], index: 1, kind: output, shape index: {}]  }
   0x1   :  { %7 = vsyncpa [#allocation4], 0  ;;  %s88_s6 = smov [#allocation2]   ;;  %s40_s10 = scalar_lea.hbm %s124_s0, 128 }
   0x2   :  { %s14_s7 = sshll.u32 %s88_s6, 4  ;;  %p41_p0 = scmp.ne.s32.totalorder %s124_s0, %s40_s10  ;;  %s15_s7 = int_to_ptr.vmem [resolvable:$true] %s14_s7 }
   0x3   :  { %p44_p1 = scmp.lt.u32.totalorder %s40_s10, %s124_s0 }
   0x5   :  { %p46_p2 = pnand %p44_p1, %p41_p0 }
   0x7   :  { %49 = shalt.err (!%p46_p2)
}
   0x8   :  { %s50_s15 = scalar_lea.vmem %s15_s7, 128  ;;  %p55_p4 = scmp.lt.s32.totalorder %s15_s7, %s15_s7 }
   0x9   :  { %p51_p3 = scmp.ne.s32.totalorder %s15_s7, %s50_s15  ;;  %p56_p5 = scmp.lt.s32.totalorder %s50_s15, %s50_s15 }
   0xb   :  { %p57_p6 = por %p56_p5, %p55_p4 }
   0xd   :  { %p58_p7 = pnand %p57_p6, %p51_p3 }
   0xf   :  { %61 = shalt.err (!%p58_p7)
}
  0x10   :  { %17 = dma.hbm_to_vmem [thread:$0]  %s124_s0, 128, %s15_s7, [#allocation3]  }
  0x11   :  { %84 = dma.done.wait [#allocation3], 128  }
  0x12   :  { %85 = vsyncadd [#allocation3], 4294967168  ;;  %s89_s18 = smov [#allocation5]   ;;  %v21_v0 = vld [vmem:[#allocation2] sm:$0xff] }
  0x13   :  { %s29_s19 = sshll.u32 %s89_s18, 4  ;;  %22 = vst [vmem:[#allocation5] sm:$0xff] %v21_v0  ;;  %s30_s19 = int_to_ptr.vmem [resolvable:$true] %s29_s19 }
  0x14   :  { %s62_s20 = scalar_lea.vmem %s30_s19, 128  ;;  %p67_p9 = scmp.lt.s32.totalorder %s30_s19, %s30_s19 }
  0x15   :  { %p63_p8 = scmp.ne.s32.totalorder %s30_s19, %s62_s20  ;;  %p68_p10 = scmp.lt.s32.totalorder %s62_s20, %s62_s20 }
  0x17   :  { %p69_p11 = por %p68_p10, %p67_p9 }
  0x19   :  { %p70_p12 = pnand %p69_p11, %p63_p8 }
  0x1b   :  { %73 = shalt.err (!%p70_p12)
}
  0x1c   :  { %s74_s23 = scalar_lea.hbm %s125_s1, 128 }
  0x1d   :  { %p75_p13 = scmp.ne.s32.totalorder %s125_s1, %s74_s23  ;;  %p78_p0 = scmp.lt.u32.totalorder %s74_s23, %s125_s1 }
  0x1f   :  { %p80_p1 = pnand %p78_p0, %p75_p13 }
  0x21   :  { %83 = shalt.err (!%p80_p1)
}
  0x22   :  { %32 = dma.vmem_to_hbm [thread:$0]  %s30_s19, 128, %s125_s1, [#allocation4]  }
  0x23   :  { %86 = dma.done.wait [#allocation4], 128  }
  0x24   :  { %87 = vsyncadd [#allocation4], 4294967168 }
  0x25   :  { %36 = vsyncpa [#allocation3], 1 }
  0x26   :  { %37 = vsyncpa [#allocation4], 1 }

// kernel: tpu_custom_call.1
= control target key start
LH: loop header
LB: loop body
LE: loop exit
PB: predicated region body
PF: predicated region fallthrough
CT: control target
= control target key end

     0   :  { %18 = vsyncpa [#allocation3], 0  ;;  %s3465_s0 = inlined_call_operand.hbm [shape: bf16[2,16,32], index: 0, kind: input, shape index: {}]   ;;  %s3466_s1 = inlined_call_operand.hbm [shape: bf16[32,32], index: 1, kind: input, shape index: {}]   ;;  %s3467_s2 = inlined_call_operand.hbm [shape: f32[1,32], index: 2, kind: input, shape index: {}]   ;;  %s3468_s3 = inlined_call_operand.hbm [shape: f32[8,32], index: 3, kind: input, shape index: {}]   ;;  %s3469_s4 = inlined_call_operand.hbm [shape: f32[5,32], index: 4, kind: input, shape index: {}]   ;;  %s3470_s5 = inlined_call_operand.hbm [shape: f32[1,32], index: 5, kind: input, shape index: {}]   ;;  %s3471_s6 = inlined_call_operand.hbm [shape: f32[2,16,32], index: 6, kind: output, shape index: {0}]   ;;  %s3472_s7 = inlined_call_operand.hbm [shape: f32[2,8,32], index: 7, kind: output, shape index: {1}]   ;;  %s3473_s8 = inlined_call_operand.hbm [shape: f32[2,16,16], index: 8, kind: output, shape index: {2}]   ;;  %s3474_s9 = inlined_call_operand.hbm [shape: bf16[2,16,32], index: 9, kind: output, shape index: {3}]   ;;  %s3475_s10 = inlined_call_operand.hbm [shape: f32[2,6,16], index: 10, kind: output, shape index: {4}]   ;;  %s3476_s11 = inlined_call_operand.hbm [shape: f32[2,5,2], index: 11, kind: output, shape index: {5}]   ;;  %s3477_s12 = inlined_call_operand.hbm [shape: f32[2,8,5], index: 12, kind: output, shape index: {6}]  }
   0x1   :  { %19 = vsyncpa [#allocation6], 0 }
   0x2   :  { %20 = vsyncpa [#allocation9], 0 }
   0x3   :  { %21 = vsyncpa [#allocation12], 0 }
   0x4   :  { %22 = vsyncpa [#allocation4], 0 }
   0x5   :  { %23 = vsyncpa [#allocation15], 0 }
   0x6   :  { %24 = vsyncpa [#allocation18], 0 }
   0x7   :  { %25 = vsyncpa [#allocation21], 0  ;;  %s2856_s21 = smov [#allocation5]   ;;  %s2857_s23 = smov [#allocation8]  }
   0x8   :  { %s43_s22 = sshll.u32 %s2856_s21, 4  ;;  %s66_s24 = sshll.u32 %s2857_s23, 4  ;;  %s44_s22 = int_to_ptr.vmem [resolvable:$true] %s43_s22  ;;  %s67_s24 = int_to_ptr.vmem [resolvable:$true] %s66_s24 }
   0x9   :  { %s2554_s27 = scalar_lea.hbm %s3466_s1, 256 }
   0xa   :  { %p2555_p0 = scmp.ne.s32.totalorder %s3466_s1, %s2554_s27  ;;  %p2558_p1 = scmp.lt.u32.totalorder %s2554_s27, %s3466_s1 }
   0xc   :  { %p2560_p2 = pnand %p2558_p1, %p2555_p0 }
   0xe   :  { %2563 = shalt.err (!%p2560_p2)
}
   0xf   :  { %s2564_s14 = scalar_lea.vmem %s44_s22, 256  ;;  %p2569_p4 = scmp.lt.s32.totalorder %s44_s22, %s44_s22 }
  0x10   :  { %p2565_p3 = scmp.ne.s32.totalorder %s44_s22, %s2564_s14  ;;  %p2570_p5 = scmp.lt.s32.totalorder %s2564_s14, %s2564_s14 }
  0x12   :  { %p2571_p6 = por %p2570_p5, %p2569_p4 }
  0x14   :  { %p2572_p7 = pnand %p2571_p6, %p2565_p3 }
  0x16   :  { %2575 = shalt.err (!%p2572_p7)
}
  0x17   :  { %s2858_s15 = smov 64   ;;  %s2859_s16 = smov 4  }
  0x18   :  { %49 = dma.hbm_to_vmem [thread:$0]  %s3466_s1, 256, %s44_s22, [#allocation6], %s2858_s15, %s2858_s15, %s2859_s16  }
  0x19   :  { %s2576_s21 = scalar_lea.hbm %s3468_s3, 128 }
  0x1a   :  { %p2577_p8 = scmp.ne.s32.totalorder %s3468_s3, %s2576_s21  ;;  %p2580_p9 = scmp.lt.u32.totalorder %s2576_s21, %s3468_s3 }
  0x1c   :  { %p2582_p10 = pnand %p2580_p9, %p2577_p8 }
  0x1e   :  { %2585 = shalt.err (!%p2582_p10)
}
  0x1f   :  { %s2586_s28 = scalar_lea.vmem %s67_s24, 128  ;;  %p2591_p12 = scmp.lt.s32.totalorder %s67_s24, %s67_s24 }
  0x20   :  { %p2587_p11 = scmp.ne.s32.totalorder %s67_s24, %s2586_s28  ;;  %p2592_p13 = scmp.lt.s32.totalorder %s2586_s28, %s2586_s28 }
  0x22   :  { %p2593_p0 = por %p2592_p13, %p2591_p12 }
  0x24   :  { %p2594_p1 = pnand %p2593_p0, %p2587_p11 }
  0x26   :  { %2597 = shalt.err (!%p2594_p1)
}
  0x27   :  { %69 = dma.hbm_to_vmem [thread:$0]  %s3468_s3, 128, %s67_s24, [#allocation9]  }
  0x28   :  { %s2860_s29 = smov [#allocation2]   ;;  %s2861_s13 = smov [#allocation7]  }
  0x29   :  { %s31_s30 = sshll.u32 %s2860_s29, 4  ;;  %s56_s14 = sshll.u32 %s2861_s13, 4  ;;  %s32_s30 = int_to_ptr.vmem [resolvable:$true] %s31_s30  ;;  %s57_s14 = int_to_ptr.vmem [resolvable:$true] %s56_s14 }
  0x2a   :  { %s2598_s19 = scalar_lea.hbm %s3465_s0, 256 }
  0x2b   :  { %p2599_p2 = scmp.ne.s32.totalorder %s3465_s0, %s2598_s19  ;;  %p2602_p3 = scmp.lt.u32.totalorder %s2598_s19, %s3465_s0 }
  0x2d   :  { %p2604_p4 = pnand %p2602_p3, %p2599_p2 }
  0x2f   :  { %2607 = shalt.err (!%p2604_p4)
}
  0x30   :  { %s2608_s3 = scalar_lea.vmem %s32_s30, 256  ;;  %p2613_p6 = scmp.lt.s32.totalorder %s32_s30, %s32_s30 }
  0x31   :  { %p2609_p5 = scmp.ne.s32.totalorder %s32_s30, %s2608_s3  ;;  %p2614_p7 = scmp.lt.s32.totalorder %s2608_s3, %s2608_s3 }
  0x33   :  { %p2615_p8 = por %p2614_p7, %p2613_p6 }
  0x35   :  { %p2616_p9 = pnand %p2615_p8, %p2609_p5 }
  0x37   :  { %2619 = shalt.err (!%p2616_p9)
}
  0x38   :  { %37 = dma.hbm_to_vmem [thread:$0]  %s3465_s0, 256, %s32_s30, [#allocation3], %s2858_s15, %s2858_s15, %s2859_s16  }
  0x39   :  { %s2620_s1 = scalar_lea.hbm %s3467_s2, 16 }
  0x3a   :  { %p2621_p10 = scmp.ne.s32.totalorder %s3467_s2, %s2620_s1  ;;  %p2624_p11 = scmp.lt.u32.totalorder %s2620_s1, %s3467_s2 }
  0x3c   :  { %p2626_p12 = pnand %p2624_p11, %p2621_p10 }
  0x3e   :  { %2629 = shalt.err (!%p2626_p12)
}
  0x3f   :  { %s2630_s18 = scalar_lea.vmem %s57_s14, 16  ;;  %s2634_s19 = scalar_lea.vmem %s57_s14, 32 }
  0x40   :  { %p2631_p13 = scmp.ne.s32.totalorder %s57_s14, %s2630_s18  ;;  %p2635_p0 = scmp.lt.s32.totalorder %s57_s14, %s57_s14 }
  0x41   :  { %p2636_p1 = scmp.lt.s32.totalorder %s2634_s19, %s2630_s18 }
  0x43   :  { %p2637_p2 = por %p2636_p1, %p2635_p0 }
  0x45   :  { %p2638_p3 = pnand %p2637_p2, %p2631_p13 }
  0x47   :  { %2641 = shalt.err (!%p2638_p3)
}
  0x48   :  { %59 = dma.hbm_to_vmem [thread:$0]  %s3467_s2, 16, %s57_s14, [#allocation6]  }
  0x49   :  { %s2862_s20 = smov [#allocation10]   ;;  %s2863_s23 = smov [#allocation11]  }
  0x4a   :  { %s76_s21 = sshll.u32 %s2862_s20, 4  ;;  %s86_s25 = sshll.u32 %s2863_s23, 4  ;;  %s77_s21 = int_to_ptr.vmem [resolvable:$true] %s76_s21  ;;  %s87_s25 = int_to_ptr.vmem [resolvable:$true] %s86_s25 }
  0x4b   :  { %s2642_s26 = scalar_lea.hbm %s3469_s4, 128 }
  0x4c   :  { %p2643_p4 = scmp.ne.s32.totalorder %s3469_s4, %s2642_s26  ;;  %p2646_p5 = scmp.lt.u32.totalorder %s2642_s26, %s3469_s4 }
  0x4e   :  { %p2648_p6 = pnand %p2646_p5, %p2643_p4 }
  0x50   :  { %2651 = shalt.err (!%p2648_p6)
}
  0x51   :  { %s2652_s2 = scalar_lea.vmem %s77_s21, 128  ;;  %p2657_p8 = scmp.lt.s32.totalorder %s77_s21, %s77_s21 }
  0x52   :  { %p2653_p7 = scmp.ne.s32.totalorder %s77_s21, %s2652_s2  ;;  %p2658_p9 = scmp.lt.s32.totalorder %s2652_s2, %s2652_s2 }
  0x54   :  { %p2659_p10 = por %p2658_p9, %p2657_p8 }
  0x56   :  { %p2660_p11 = pnand %p2659_p10, %p2653_p7 }
  0x58   :  { %2663 = shalt.err (!%p2660_p11)
}
  0x59   :  { %79 = dma.hbm_to_vmem [thread:$0]  %s3469_s4, 128, %s77_s21, [#allocation9]  }
  0x5a   :  { %s2664_s18 = scalar_lea.hbm %s3470_s5, 16 }
  0x5b   :  { %p2665_p12 = scmp.ne.s32.totalorder %s3470_s5, %s2664_s18  ;;  %p2668_p13 = scmp.lt.u32.totalorder %s2664_s18, %s3470_s5 }
  0x5d   :  { %p2670_p0 = pnand %p2668_p13, %p2665_p12 }
  0x5f   :  { %2673 = shalt.err (!%p2670_p0)
}
  0x60   :  { %s2674_s23 = scalar_lea.vmem %s87_s25, 16  ;;  %s2678_s3 = scalar_lea.vmem %s87_s25, 32 }
  0x61   :  { %p2675_p1 = scmp.ne.s32.totalorder %s87_s25, %s2674_s23  ;;  %p2679_p2 = scmp.lt.s32.totalorder %s87_s25, %s87_s25 }
  0x62   :  { %p2680_p3 = scmp.lt.s32.totalorder %s2678_s3, %s2674_s23 }
  0x64   :  { %p2681_p4 = por %p2680_p3, %p2679_p2 }
  0x66   :  { %p2682_p5 = pnand %p2681_p4, %p2675_p1 }
  0x68   :  { %2685 = shalt.err (!%p2682_p5)
}
  0x69   :  { %89 = dma.hbm_to_vmem [thread:$0]  %s3470_s5, 16, %s87_s25, [#allocation12]  }
  0x6a   :  { %2840 = dma.done.wait [#allocation3], 256  }
  0x6b   :  { %2841 = vsyncadd [#allocation3], 4294967040 }
  0x6c   :  { %2842 = dma.done.wait [#allocation6], 272  }
  0x6d   :  { %2843 = vsyncadd [#allocation6], 4294967024 }
  0x6e   :  { %2844 = dma.done.wait [#allocation9], 256  }
  0x6f   :  { %2845 = vsyncadd [#allocation9], 4294967040 }
  0x70   :  { %2846 = dma.done.wait [#allocation12], 16  }
  0x71   :  { %2847 = vsyncadd [#allocation12], 4294967280  ;;  %v2398_v0 = vld [vmem:[#allocation5] sm:$0xff]   ;;  %v2399_v1 = vld [vmem:[#allocation5 + $0x8] sm:$0xff]   ;;  %vm146_vm0 = vcmask 261120   ;;  %v2864_v28 = vmov 0.0  }
  0x72   :  { %2222 = vmatprep.subr.bf16.mxu0 %v2398_v0  ;;  %v2400_v2 = vld [vmem:[#allocation2] sm:$0xff]   ;;  %v2401_v3 = vld [vmem:[#allocation2 + $0x8] sm:$0xff]   ;;  %2230 = vmatprep.subr.bf16.mxu1 %v2864_v28  ;;  %vm2865_vm1 = vmmov 0   ;;  %vm377_vm12 = vcmask 130048   ;;  %s2866_s5 = smov [#allocation14]   ;;  %s2867_s24 = smov [#allocation17]  }
  0x73   :  { %2223 = vmatpush3.bf16.msra.mxu0 %v2398_v0  ;;  %2226 = vmatprep.mubr.msk.bf16.mxu0 %vm146_vm0, %v2400_v2  ;;  %v2119_v4 = vld [vmem:[#allocation7] ss:$0 sm:$0xff]  ;;  %v3041_v21 = vld [vmem:[#allocation8] sm:$0xff]  ;;  %s2023_s25 = sshll.u32 %s2866_s5, 4  ;;  %s2047_s26 = sshll.u32 %s2867_s24, 4  ;;  %s2024_s25 = int_to_ptr.vmem [resolvable:$true] %s2023_s25  ;;  %s3327_s26 = int_to_ptr.vmem [resolvable:$true] %s2047_s26 }
  0x74   :  { %2224 = vmatprep.subr.bf16.mxu0 %v2399_v1  ;;  %v271_v24 = vmul.f32 %v3041_v21, %v3041_v21  ;;  %2232 = vmatprep.mubr.msk.bf16.mxu1 %vm2865_vm1, %v2864_v28  ;;  %s2686_s27 = scalar_lea.vmem %s2024_s25, 256  ;;  %p2691_p7 = scmp.lt.s32.totalorder %s2024_s25, %s2024_s25 }
  0x75   :  { %p2687_p6 = scmp.ne.s32.totalorder %s2024_s25, %s2686_s27  ;;  %p2692_p8 = scmp.lt.s32.totalorder %s2686_s27, %s2686_s27 }
  0x76   :  { %v272_v27 = vsel %vm146_vm0, %v271_v24, 0.0 }
  0x77   :  { %2225 = vmatpush3.bf16.msra.mxu0 %v2399_v1  ;;  %p2693_p9 = por %p2692_p8, %p2691_p7 }
  0x78   :  { %2236 = vmatprep.subr.bf16.mxu0 %v2864_v28 }
  0x79   :  { %p2694_p10 = pnand %p2693_p9, %p2687_p6 }
  0x7a   :  { %2227 = vmatmul.mubr.msk.bf16.vlgmr.msra.gmra.mrb[0].mxu0 %vm146_vm0, %v2401_v3 }
  0x7b   :  { %2238 = vmatprep.mubr.msk.bf16.mxu0 %vm2865_vm1, %v2864_v28 }
 0x14d   :  { %v2228_v5 = vpop.f32.mrb[0].mxu0 }
 0x14e   :  { %v196_v6 = vadd.f32 %v2228_v5, %v2119_v4  ;;  %v187_v7 = vpop.f32.mrb[1].mxu0 }
 0x14f   :  { %v188_v8 = vadd.f32 %v2119_v4, %v187_v7  ;;  %v2229_v9 = vpop.f32.mrb[2].mxu0 }
 0x150   :  { %v3020_v10 = vmax.f32 %v196_v6, 0.0  ;;  %v199_v11 = vadd.f32 %v2229_v9, %v2119_v4  ;;  %v190_v12 = vpop.f32.mrb[3].mxu0 }
 0x151   :  { %v3022_v13 = vmax.f32 %v188_v8, 0.0  ;;  %v191_v14 = vadd.f32 %v2119_v4, %v190_v12 }
 0x152   :  { %208 = vst.msk [vmem:[#allocation13 + $0x10] sm:$0xff] %vm146_vm0, %v3020_v10  ;;  %v3026_v15 = vmax.f32 %v199_v11, 0.0  ;;  %v214_v16 = vmul.f32 %v3020_v10, %v3020_v10 }
 0x153   :  { %206 = vst.msk [vmem:[#allocation13] sm:$0xff] %vm146_vm0, %v3022_v13  ;;  %v3032_v17 = vmax.f32 %v191_v14, 0.0  ;;  %v212_v18 = vmul.f32 %v3022_v13, %v3022_v13 }
 0x154   :  { %209 = vst.msk [vmem:[#allocation13 + $0x18] sm:$0xff] %vm146_vm0, %v3026_v15  ;;  %v222_v19 = vsel %vm146_vm0, %v214_v16, 0.0  ;;  %v215_v20 = vmul.f32 %v3026_v15, %v3026_v15 }
 0x155   :  { %207 = vst.msk [vmem:[#allocation13 + $0x8] sm:$0xff] %vm146_vm0, %v3032_v17  ;;  %223 = vadd.xlane.f32.xlu1 %v222_v19  ;;  %v216_v22 = vsel %vm146_vm0, %v212_v18, 0.0  ;;  %v213_v23 = vmul.f32 %v3032_v17, %v3032_v17  ;;  %v3082_v19 = vpack.c.bf16 %v3026_v15, %v3020_v10 }
 0x156   :  { %217 = vadd.xlane.f32.xlu0 %v216_v22  ;;  %v225_v25 = vsel %vm146_vm0, %v215_v20, 0.0  ;;  %v3087_v20 = vpack.c.bf16 %v3032_v17, %v3022_v13 }
 0x157   :  { %v219_v26 = vsel %vm146_vm0, %v213_v23, 0.0 }
 0x159   :  { %226 = vadd.xlane.f32.xlu1 %v225_v25 }
 0x15a   :  { %220 = vadd.xlane.f32.xlu0 %v219_v26 }
 0x15e   :  { %273 = vadd.xlane.f32.xlu0 %v272_v27 }
 0x1e2   :  { %v224_v29 = vpop.xlane.xlu1 %223 }
 0x1e3   :  { %2402 = vrsqrt.f32 %v224_v29  ;;  %v218_v30 = vpop.xlane.xlu0 %217  ;;  %vm244_vm2 = vcmp.eq.f32.partialorder %v224_v29, inf  ;;  %v247_v37 = vand.u32 2147483648, %v224_v29  ;;  %vm246_vm3 = vcmp.eq.f32.partialorder %v224_v29, 0.0 }
 0x1e4   :  { %2404 = vrsqrt.f32 %v218_v30  ;;  %vm230_vm4 = vcmp.eq.f32.partialorder %v218_v30, inf  ;;  %v233_v40 = vand.u32 2147483648, %v218_v30  ;;  %vm232_vm5 = vcmp.eq.f32.partialorder %v218_v30, 0.0 }
 0x1e6   :  { %v227_v31 = vpop.xlane.xlu1 %226 }
 0x1e7   :  { %2406 = vrsqrt.f32 %v227_v31  ;;  %v221_v32 = vpop.xlane.xlu0 %220  ;;  %vm251_vm6 = vcmp.eq.f32.partialorder %v227_v31, inf  ;;  %v254_v49 = vand.u32 2147483648, %v227_v31  ;;  %vm253_vm7 = vcmp.eq.f32.partialorder %v227_v31, 0.0 }
 0x1e8   :  { %2408 = vrsqrt.f32 %v221_v32  ;;  %vm237_vm8 = vcmp.eq.f32.partialorder %v221_v32, inf  ;;  %v240_v52 = vand.u32 2147483648, %v221_v32  ;;  %vm239_vm9 = vcmp.eq.f32.partialorder %v221_v32, 0.0 }
 0x1eb   :  { %v274_v33 = vpop.xlane.xlu0 %273 }
 0x1ec   :  { %2410 = vrsqrt.f32 %v274_v33  ;;  %vm277_vm10 = vcmp.eq.f32.partialorder %v274_v33, inf  ;;  %v280_v60 = vand.u32 2147483648, %v274_v33  ;;  %vm279_vm11 = vcmp.eq.f32.partialorder %v274_v33, 0.0 }
 0x1ed   :  { %v2403_v34 = vpop.eup %2402 }
 0x1ee   :  { %v2405_v35 = vpop.eup %2404  ;;  %v243_v36 = vmul.f32 %v2403_v34, %v224_v29 }
 0x1ef   :  { %v229_v38 = vmul.f32 %v2405_v35, %v218_v30 }
 0x1f0   :  { %v245_v39 = vsel %vm244_vm2, %v224_v29, %v243_v36 }
 0x1f1   :  { %v2407_v41 = vpop.eup %2406  ;;  %v248_v42 = vsel %vm246_vm3, %v247_v37, %v245_v39  ;;  %v231_v43 = vsel %vm230_vm4, %v218_v30, %v229_v38 }
 0x1f2   :  { %v2409_v44 = vpop.eup %2408  ;;  %v258_v45 = vadd.f32 1e-09, %v248_v42  ;;  %v234_v46 = vsel %vm232_vm5, %v233_v40, %v231_v43  ;;  %v250_v47 = vmul.f32 %v2407_v41, %v227_v31 }
 0x1f3   :  { %v256_v48 = vadd.f32 1e-09, %v234_v46  ;;  %v236_v50 = vmul.f32 %v2409_v44, %v221_v32 }
 0x1f4   :  { %v252_v51 = vsel %vm251_vm6, %v227_v31, %v250_v47  ;;  %2412 = vrcp.f32 %v258_v45 }
 0x1f5   :  { %v255_v53 = vsel %vm253_vm7, %v254_v49, %v252_v51  ;;  %v238_v54 = vsel %vm237_vm8, %v221_v32, %v236_v50  ;;  %2414 = vrcp.f32 %v256_v48  ;;  %vm1030_vm7 = vcmask 64512  }
 0x1f6   :  { %v2411_v55 = vpop.eup %2410  ;;  %v259_v56 = vadd.f32 1e-09, %v255_v53  ;;  %v241_v57 = vsel %vm239_vm9, %v240_v52, %v238_v54  ;;  %vm1080_vm8 = vcmask 1043456  }
 0x1f7   :  { %v257_v58 = vadd.f32 1e-09, %v241_v57  ;;  %v276_v59 = vmul.f32 %v2411_v55, %v274_v33 }
 0x1f8   :  { %2416 = vrcp.f32 %v259_v56 }
 0x1f9   :  { %2418 = vrcp.f32 %v257_v58  ;;  %v278_v61 = vsel %vm277_vm10, %v274_v33, %v276_v59 }
 0x1fa   :  { %v281_v62 = vsel %vm279_vm11, %v280_v60, %v278_v61  ;;  %vm1309_vm11 = vcmask 257024  }
 0x1fb   :  { %v282_v63 = vadd.f32 1e-09, %v281_v62 }
 0x1fd   :  { %2420 = vrcp.f32 %v282_v63 }
 0x1fe   :  { %v2413_v0 = vpop.eup %2412 }
 0x1ff   :  { %v2415_v1 = vpop.eup %2414  ;;  %v265_v4 = vmul.f32 %v2413_v0, %v3020_v10 }
 0x200   :  { %v261_v6 = vmul.f32 %v2415_v1, %v3022_v13 }
 0x202   :  { %v2417_v2 = vpop.eup %2416 }
 0x203   :  { %v2419_v3 = vpop.eup %2418  ;;  %v267_v5 = vmul.f32 %v2417_v2, %v3026_v15 }
 0x204   :  { %v263_v7 = vmul.f32 %v2419_v3, %v3032_v17 }
 0x205   :  { %v3063_v8 = vpack.c.bf16 %v267_v5, %v265_v4 }
 0x206   :  { %v3065_v9 = vpack.c.bf16 %v263_v7, %v261_v6 }
 0x207   :  { %v2421_v11 = vpop.eup %2420  ;;  %v3069_v12 = vsel %vm146_vm0, %v3063_v8, 0 }
 0x208   :  { %2237 = vmatpush3.bf16.xpose.msra.mxu0 %v3069_v12  ;;  %v3074_v14 = vsel %vm146_vm0, %v3065_v9, 0  ;;  %v284_v16 = vmul.f32 %v2421_v11, %v3041_v21 }
 0x209   :  { %2231 = vmatpush3.bf16.xpose.msra.mxu1 %v3074_v14  ;;  %2248 = vmatprep.subr.bf16.mxu0 %v2864_v28 }
 0x20a   :  { %2242 = vmatprep.subr.bf16.mxu1 %v2864_v28  ;;  %v285_v18 = vpack.c.bf16 %v284_v16, %v284_v16 }
 0x20f   :  { %2239 = vmatmul.mubr.msk.bf16.vlgmr.msra.gmra.mrb[4].mxu0 %vm146_vm0, %v285_v18 }
 0x210   :  { %2233 = vmatmul.mubr.msk.bf16.vlgmr.msra.gmra.mrb[0].mxu1 %vm146_vm0, %v285_v18  ;;  %2249 = vmatpush3.bf16.msra.mxu0 %v3082_v19 }
 0x211   :  { %2243 = vmatpush3.bf16.msra.mxu1 %v3087_v20  ;;  %2250 = vmatprep.mubr.msk.bf16.mxu0 %vm2865_vm1, %v2864_v28 }
 0x212   :  { %2260 = vmatprep.subr.bf16.mxu0 %v2864_v28  ;;  %2244 = vmatprep.mubr.msk.bf16.mxu1 %vm2865_vm1, %v2864_v28 }
 0x213   :  { %2254 = vmatprep.subr.bf16.mxu1 %v2864_v28 }
 0x2e2   :  { %v369_v21 = vpop.f32.mrb[4].mxu0 }
 0x2e3   :  { %v376_v22 = vmul.f32 5.0, %v369_v21  ;;  %v326_v23 = vpop.f32.mrb[0].mxu1  ;;  %v2240_v24 = vpop.f32.mrb[5].mxu0 }
 0x2e4   :  { %v375_v25 = vmul.f32 5.0, %v326_v23  ;;  %v2234_v26 = vpop.f32.mrb[1].mxu1  ;;  %v372_v27 = vpop.f32.mrb[6].mxu0 }
 0x2e5   :  { %v385_v29 = vsel %vm377_vm12, %v376_v22, -inf  ;;  %v329_v30 = vpop.f32.mrb[2].mxu1  ;;  %v2241_v31 = vpop.f32.mrb[7].mxu0 }
 0x2e6   :  { %v386_v32 = vrot.slane %v385_v29, 4  ;;  %v378_v33 = vsel %vm377_vm12, %v375_v25, -inf  ;;  %v2235_v34 = vpop.f32.mrb[3].mxu1 }
 0x2e7   :  { %v379_v35 = vrot.slane %v378_v33, 4 }
 0x2e8   :  { %v387_v36 = vmax.f32 %v385_v29, %v386_v32 }
 0x2e9   :  { %v380_v37 = vmax.f32 %v378_v33, %v379_v35 }
 0x2ea   :  { %v388_v38 = vrot.slane %v387_v36, 2 }
 0x2eb   :  { %v381_v39 = vrot.slane %v380_v37, 2 }
 0x2ec   :  { %v389_v40 = vmax.f32 %v387_v36, %v388_v38 }
 0x2ed   :  { %v382_v41 = vmax.f32 %v380_v37, %v381_v39 }
 0x2ee   :  { %v390_v42 = vrot.slane %v389_v40, 1 }
 0x2ef   :  { %v383_v43 = vrot.slane %v382_v41, 1 }
 0x2f0   :  { %v391_v44 = vmax.f32 %v389_v40, %v390_v42 }
 0x2f1   :  { %v384_v45 = vmax.f32 %v382_v41, %v383_v43 }
 0x2f2   :  { %v393_v46 = vsub.f32 %v376_v22, %v391_v44 }
 0x2f3   :  { %v392_v47 = vsub.f32 %v375_v25, %v384_v45 }
 0x2f4   :  { %v396_v48 = vmul.f32 1.442695, %v393_v46 }
 0x2f5   :  { %v394_v49 = vmul.f32 1.442695, %v392_v47 }
 0x2f6   :  { %2422 = vpow2.f32 %v396_v48 }
 0x2f7   :  { %2424 = vpow2.f32 %v394_v49 }
 0x300   :  { %v2423_v50 = vpop.eup %2422 }
 0x301   :  { %v2425_v51 = vpop.eup %2424  ;;  %v405_v52 = vsel %vm377_vm12, %v2423_v50, 0.0 }
 0x302   :  { %v406_v53 = vrot.slane %v405_v52, 4  ;;  %v398_v54 = vsel %vm377_vm12, %v2425_v51, 0.0 }
 0x303   :  { %v399_v55 = vrot.slane %v398_v54, 4 }
 0x304   :  { %v407_v56 = vadd.f32 %v406_v53, %v405_v52 }
 0x305   :  { %v400_v57 = vadd.f32 %v399_v55, %v398_v54 }
 0x306   :  { %v408_v58 = vrot.slane %v407_v56, 2 }
 0x307   :  { %v401_v59 = vrot.slane %v400_v57, 2 }
 0x308   :  { %v409_v60 = vadd.f32 %v408_v58, %v407_v56 }
 0x309   :  { %v402_v61 = vadd.f32 %v401_v59, %v400_v57 }
 0x30a   :  { %v410_v62 = vrot.slane %v409_v60, 1 }
 0x30b   :  { %v403_v63 = vrot.slane %v402_v61, 1 }
 0x30c   :  { %v411_v0 = vadd.f32 %v410_v62, %v409_v60 }
 0x30d   :  { %v404_v1 = vadd.f32 %v403_v63, %v402_v61 }
 0x30e   :  { %2426 = vrcp.f32 %v411_v0 }
 0x30f   :  { %2428 = vrcp.f32 %v404_v1 }
 0x318   :  { %v2427_v2 = vpop.eup %2426 }
 0x319   :  { %v2429_v3 = vpop.eup %2428  ;;  %v415_v4 = vmul.f32 %v2427_v2, %v2423_v50 }
 0x31a   :  { %v413_v5 = vmul.f32 %v2429_v3, %v2425_v51 }
 0x31b   :  { %v419_v6 = vsel %vm377_vm12, %v415_v4, 0.0 }
 0x31c   :  { %420 = vadd.xlane.f32.xlu0 %v419_v6  ;;  %v416_v7 = vsel %vm377_vm12, %v413_v5, 0.0 }
 0x31d   :  { %417 = vadd.xlane.f32.xlu1 %v416_v7 }
 0x3a9   :  { %v421_v11 = vpop.xlane.xlu0 %420 }
 0x3aa   :  { %v423_v16 = vadd.f32 1e-09, %v421_v11  ;;  %v418_v18 = vpop.xlane.xlu1 %417 }
 0x3ab   :  { %v422_v21 = vadd.f32 1e-09, %v418_v18 }
 0x3ac   :  { %2430 = vrcp.f32 %v423_v16 }
 0x3ad   :  { %2432 = vrcp.f32 %v422_v21 }
 0x3b6   :  { %v2431_v22 = vpop.eup %2430 }
 0x3b7   :  { %v2433_v23 = vpop.eup %2432  ;;  %v427_v24 = vmul.f32 %v2431_v22, %v415_v4 }
 0x3b8   :  { %v425_v25 = vmul.f32 %v2433_v23, %v413_v5 }
 0x3b9   :  { %v429_v26 = vpack.c.bf16 %v427_v24, %v427_v24 }
 0x3ba   :  { %v428_v27 = vpack.c.bf16 %v425_v25, %v425_v25 }
 0x3bb   :  { %2251 = vmatmul.mubr.msk.bf16.vlgmr.msra.gmra.mrb[8].mxu0 %vm377_vm12, %v429_v26 }
 0x3bc   :  { %2261 = vmatpush3.bf16.xpose.msra.mxu0 %v3069_v12  ;;  %2245 = vmatmul.mubr.msk.bf16.vlgmr.msra.gmra.mrb[4].mxu1 %vm377_vm12, %v428_v27 }
 0x3bd   :  { %2255 = vmatpush3.bf16.xpose.msra.mxu1 %v3074_v14  ;;  %2262 = vmatprep.mubr.msk.bf16.mxu0 %vm2865_vm1, %v2864_v28 }
 0x3be   :  { %2272 = vmatprep.subr.bf16.mxu0 %v2864_v28  ;;  %2256 = vmatprep.mubr.msk.bf16.mxu1 %vm2865_vm1, %v2864_v28 }
 0x3bf   :  { %2266 = vmatprep.subr.bf16.mxu1 %v2864_v28 }
 0x48e   :  { %v510_v29 = vpop.f32.mrb[8].mxu0 }
 0x48f   :  { %v517_v30 = vmul.f32 %v510_v29, %v510_v29  ;;  %v467_v31 = vpop.f32.mrb[4].mxu1  ;;  %v2252_v32 = vpop.f32.mrb[9].mxu0 }
 0x490   :  { %v516_v33 = vmul.f32 %v467_v31, %v467_v31  ;;  %v2246_v34 = vpop.f32.mrb[5].mxu1  ;;  %v513_v35 = vpop.f32.mrb[10].mxu0 }
 0x491   :  { %v470_v36 = vpop.f32.mrb[6].mxu1  ;;  %v2253_v37 = vpop.f32.mrb[11].mxu0  ;;  %v521_v38 = vsel %vm146_vm0, %v517_v30, 0.0 }
 0x492   :  { %522 = vadd.xlane.f32.xlu0 %v521_v38  ;;  %v2247_v39 = vpop.f32.mrb[7].mxu1  ;;  %v518_v40 = vsel %vm146_vm0, %v516_v33, 0.0 }
 0x493   :  { %519 = vadd.xlane.f32.xlu1 %v518_v40 }
 0x51f   :  { %v523_v41 = vpop.xlane.xlu0 %522 }
 0x520   :  { %2434 = vrsqrt.f32 %v523_v41  ;;  %v520_v42 = vpop.xlane.xlu1 %519  ;;  %vm533_vm13 = vcmp.eq.f32.partialorder %v523_v41, inf  ;;  %v536_v46 = vand.u32 2147483648, %v523_v41  ;;  %vm535_vm14 = vcmp.eq.f32.partialorder %v523_v41, 0.0 }
 0x521   :  { %2436 = vrsqrt.f32 %v520_v42  ;;  %vm526_vm15 = vcmp.eq.f32.partialorder %v520_v42, inf  ;;  %v529_v49 = vand.u32 2147483648, %v520_v42  ;;  %vm528_vm2 = vcmp.eq.f32.partialorder %v520_v42, 0.0 }
 0x52a   :  { %v2435_v43 = vpop.eup %2434 }
 0x52b   :  { %v2437_v44 = vpop.eup %2436  ;;  %v532_v45 = vmul.f32 %v2435_v43, %v523_v41 }
 0x52c   :  { %v525_v47 = vmul.f32 %v2437_v44, %v520_v42 }
 0x52d   :  { %v534_v48 = vsel %vm533_vm13, %v523_v41, %v532_v45  ;;  %vm1525_vm13 = vcmask 122880  }
 0x52e   :  { %v537_v50 = vsel %vm535_vm14, %v536_v46, %v534_v48  ;;  %v527_v51 = vsel %vm526_vm15, %v520_v42, %v525_v47  ;;  %vm1806_vm14 = vcmask 1044480   ;;  %vm1809_vm15 = vcmask 128000  }
 0x52f   :  { %v539_v52 = vadd.f32 1e-09, %v537_v50  ;;  %v530_v53 = vsel %vm528_vm2, %v529_v49, %v527_v51  ;;  %vm1512_vm2 = vcmask 126976  }
 0x530   :  { %v538_v54 = vadd.f32 1e-09, %v530_v53 }
 0x531   :  { %2438 = vrcp.f32 %v539_v52 }
 0x532   :  { %2440 = vrcp.f32 %v538_v54 }
 0x53b   :  { %v2439_v55 = vpop.eup %2438 }
 0x53c   :  { %v2441_v56 = vpop.eup %2440  ;;  %v543_v57 = vmul.f32 %v2439_v55, %v510_v29 }
 0x53d   :  { %v541_v58 = vmul.f32 %v2441_v56, %v467_v31 }
 0x53e   :  { %v545_v59 = vpack.c.bf16 %v543_v57, %v543_v57 }
 0x53f   :  { %v544_v60 = vpack.c.bf16 %v541_v58, %v541_v58 }
 0x540   :  { %2263 = vmatmul.mubr.msk.bf16.vlgmr.msra.gmra.mrb[12].mxu0 %vm146_vm0, %v545_v59 }
 0x541   :  { %2273 = vmatpush3.bf16.msra.mxu0 %v3082_v19  ;;  %2257 = vmatmul.mubr.msk.bf16.vlgmr.msra.gmra.mrb[8].mxu1 %vm146_vm0, %v544_v60 }
 0x542   :  { %2267 = vmatpush3.bf16.msra.mxu1 %v3087_v20  ;;  %2274 = vmatprep.mubr.msk.bf16.mxu0 %vm2865_vm1, %v2864_v28 }
 0x543   :  { %2284 = vmatprep.subr.bf16.mxu0 %v2864_v28  ;;  %2268 = vmatprep.mubr.msk.bf16.mxu1 %vm2865_vm1, %v2864_v28 }
 0x544   :  { %2278 = vmatprep.subr.bf16.mxu1 %v2864_v28 }
 0x613   :  { %v626_v61 = vpop.f32.mrb[12].mxu0 }
 0x614   :  { %v633_v62 = vmul.f32 5.0, %v626_v61  ;;  %v583_v63 = vpop.f32.mrb[8].mxu1  ;;  %v2264_v0 = vpop.f32.mrb[13].mxu0 }
 0x615   :  { %v632_v1 = vmul.f32 5.0, %v583_v63  ;;  %v2258_v2 = vpop.f32.mrb[9].mxu1  ;;  %v629_v3 = vpop.f32.mrb[14].mxu0 }
 0x616   :  { %v641_v4 = vsel %vm377_vm12, %v633_v62, -inf  ;;  %v586_v5 = vpop.f32.mrb[10].mxu1  ;;  %v2265_v6 = vpop.f32.mrb[15].mxu0 }
 0x617   :  { %v642_v7 = vrot.slane %v641_v4, 4  ;;  %v634_v11 = vsel %vm377_vm12, %v632_v1, -inf  ;;  %v2259_v16 = vpop.f32.mrb[11].mxu1 }
 0x618   :  { %v635_v18 = vrot.slane %v634_v11, 4 }
 0x619   :  { %v643_v21 = vmax.f32 %v641_v4, %v642_v7 }
 0x61a   :  { %v636_v22 = vmax.f32 %v634_v11, %v635_v18 }
 0x61b   :  { %v644_v23 = vrot.slane %v643_v21, 2 }
 0x61c   :  { %v637_v24 = vrot.slane %v636_v22, 2 }
 0x61d   :  { %v645_v25 = vmax.f32 %v643_v21, %v644_v23 }
 0x61e   :  { %v638_v26 = vmax.f32 %v636_v22, %v637_v24 }
 0x61f   :  { %v646_v27 = vrot.slane %v645_v25, 1 }
 0x620   :  { %v639_v29 = vrot.slane %v638_v26, 1 }
 0x621   :  { %v647_v30 = vmax.f32 %v645_v25, %v646_v27 }
 0x622   :  { %v640_v31 = vmax.f32 %v638_v26, %v639_v29 }
 0x623   :  { %v649_v32 = vsub.f32 %v633_v62, %v647_v30 }
 0x624   :  { %v648_v33 = vsub.f32 %v632_v1, %v640_v31 }
 0x625   :  { %v652_v34 = vmul.f32 1.442695, %v649_v32 }
 0x626   :  { %v650_v35 = vmul.f32 1.442695, %v648_v33 }
 0x627   :  { %2442 = vpow2.f32 %v652_v34 }
 0x628   :  { %2444 = vpow2.f32 %v650_v35 }
 0x631   :  { %v2443_v36 = vpop.eup %2442 }
 0x632   :  { %v2445_v37 = vpop.eup %2444  ;;  %v661_v38 = vsel %vm377_vm12, %v2443_v36, 0.0 }
 0x633   :  { %v662_v39 = vrot.slane %v661_v38, 4  ;;  %v654_v40 = vsel %vm377_vm12, %v2445_v37, 0.0 }
 0x634   :  { %v655_v41 = vrot.slane %v654_v40, 4 }
 0x635   :  { %v663_v42 = vadd.f32 %v662_v39, %v661_v38 }
 0x636   :  { %v656_v43 = vadd.f32 %v655_v41, %v654_v40 }
 0x637   :  { %v664_v44 = vrot.slane %v663_v42, 2 }
 0x638   :  { %v657_v45 = vrot.slane %v656_v43, 2 }
 0x639   :  { %v665_v46 = vadd.f32 %v664_v44, %v663_v42 }
 0x63a   :  { %v658_v47 = vadd.f32 %v657_v45, %v656_v43 }
 0x63b   :  { %v666_v48 = vrot.slane %v665_v46, 1 }
 0x63c   :  { %v659_v49 = vrot.slane %v658_v47, 1 }
 0x63d   :  { %v667_v50 = vadd.f32 %v666_v48, %v665_v46 }
 0x63e   :  { %v660_v51 = vadd.f32 %v659_v49, %v658_v47 }
 0x63f   :  { %2446 = vrcp.f32 %v667_v50 }
 0x640   :  { %2448 = vrcp.f32 %v660_v51 }
 0x649   :  { %v2447_v52 = vpop.eup %2446 }
 0x64a   :  { %v2449_v53 = vpop.eup %2448  ;;  %v671_v54 = vmul.f32 %v2447_v52, %v2443_v36 }
 0x64b   :  { %v669_v55 = vmul.f32 %v2449_v53, %v2445_v37 }
 0x64c   :  { %v675_v56 = vsel %vm377_vm12, %v671_v54, 0.0 }
 0x64d   :  { %676 = vadd.xlane.f32.xlu0 %v675_v56  ;;  %v672_v57 = vsel %vm377_vm12, %v669_v55, 0.0 }
 0x64e   :  { %673 = vadd.xlane.f32.xlu1 %v672_v57 }
 0x6da   :  { %v677_v58 = vpop.xlane.xlu0 %676 }
 0x6db   :  { %v679_v59 = vadd.f32 1e-09, %v677_v58  ;;  %v674_v60 = vpop.xlane.xlu1 %673 }
 0x6dc   :  { %v678_v61 = vadd.f32 1e-09, %v674_v60 }
 0x6dd   :  { %2450 = vrcp.f32 %v679_v59 }
 0x6de   :  { %2452 = vrcp.f32 %v678_v61 }
 0x6e7   :  { %v2451_v62 = vpop.eup %2450 }
 0x6e8   :  { %v2453_v63 = vpop.eup %2452  ;;  %v683_v0 = vmul.f32 %v2451_v62, %v671_v54 }
 0x6e9   :  { %v681_v1 = vmul.f32 %v2453_v63, %v669_v55 }
 0x6ea   :  { %v685_v2 = vpack.c.bf16 %v683_v0, %v683_v0 }
 0x6eb   :  { %v684_v3 = vpack.c.bf16 %v681_v1, %v681_v1 }
 0x6ec   :  { %2275 = vmatmul.mubr.msk.bf16.vlgmr.msra.gmra.mrb[16].mxu0 %vm377_vm12, %v685_v2 }
 0x6ed   :  { %2285 = vmatpush3.bf16.xpose.msra.mxu0 %v3069_v12  ;;  %2269 = vmatmul.mubr.msk.bf16.vlgmr.msra.gmra.mrb[12].mxu1 %vm377_vm12, %v684_v3 }
 0x6ee   :  { %2279 = vmatpush3.bf16.xpose.msra.mxu1 %v3074_v14  ;;  %2286 = vmatprep.mubr.msk.bf16.mxu0 %vm2865_vm1, %v2864_v28 }
 0x6ef   :  { %2280 = vmatprep.mubr.msk.bf16.mxu1 %vm2865_vm1, %v2864_v28  ;;  %2296 = vmatprep.subr.bf16.mxu0 %v2864_v28 }
 0x6f0   :  { %2290 = vmatprep.subr.bf16.mxu1 %v2864_v28 }
 0x7bf   :  { %v3142_v4 = vpop.f32.mrb[16].mxu0 }
 0x7c0   :  { %773 = vst.msk [vmem:[#allocation14 + $0x8] sm:$0xff] %vm146_vm0, %v3142_v4  ;;  %v3146_v5 = vpop.f32.mrb[12].mxu1  ;;  %v2276_v6 = vpop.f32.mrb[17].mxu0  ;;  %v775_v7 = vmul.f32 %v3142_v4, %v3142_v4 }
 0x7c1   :  { %772 = vst.msk [vmem:[#allocation14] sm:$0xff] %vm146_vm0, %v3146_v5  ;;  %v2270_v11 = vpop.f32.mrb[13].mxu1  ;;  %v769_v16 = vpop.f32.mrb[18].mxu0  ;;  %v774_v18 = vmul.f32 %v3146_v5, %v3146_v5 }
 0x7c2   :  { %v726_v21 = vpop.f32.mrb[14].mxu1  ;;  %v2277_v22 = vpop.f32.mrb[19].mxu0  ;;  %v779_v23 = vsel %vm146_vm0, %v775_v7, 0.0 }
 0x7c3   :  { %780 = vadd.xlane.f32.xlu0 %v779_v23  ;;  %v2271_v24 = vpop.f32.mrb[15].mxu1  ;;  %v776_v25 = vsel %vm146_vm0, %v774_v18, 0.0 }
 0x7c4   :  { %777 = vadd.xlane.f32.xlu1 %v776_v25 }
 0x850   :  { %v781_v26 = vpop.xlane.xlu0 %780 }
 0x851   :  { %2454 = vrsqrt.f32 %v781_v26  ;;  %v778_v27 = vpop.xlane.xlu1 %777  ;;  %vm791_vm3 = vcmp.eq.f32.partialorder %v781_v26, inf  ;;  %v794_v32 = vand.u32 2147483648, %v781_v26  ;;  %vm793_vm4 = vcmp.eq.f32.partialorder %v781_v26, 0.0 }
 0x852   :  { %2456 = vrsqrt.f32 %v778_v27  ;;  %vm784_vm5 = vcmp.eq.f32.partialorder %v778_v27, inf  ;;  %v787_v35 = vand.u32 2147483648, %v778_v27  ;;  %vm786_vm6 = vcmp.eq.f32.partialorder %v778_v27, 0.0 }
 0x85b   :  { %v2455_v29 = vpop.eup %2454 }
 0x85c   :  { %v2457_v30 = vpop.eup %2456  ;;  %v790_v31 = vmul.f32 %v2455_v29, %v781_v26 }
 0x85d   :  { %v783_v33 = vmul.f32 %v2457_v30, %v778_v27 }
 0x85e   :  { %v792_v34 = vsel %vm791_vm3, %v781_v26, %v790_v31  ;;  %vm1716_vm3 = vcmask 253952  }
 0x85f   :  { %v795_v36 = vsel %vm793_vm4, %v794_v32, %v792_v34  ;;  %v785_v37 = vsel %vm784_vm5, %v778_v27, %v783_v33 }
 0x860   :  { %v797_v38 = vadd.f32 1e-09, %v795_v36  ;;  %v788_v39 = vsel %vm786_vm6, %v787_v35, %v785_v37 }
 0x861   :  { %v796_v40 = vadd.f32 1e-09, %v788_v39 }
 0x862   :  { %2458 = vrcp.f32 %v797_v38 }
 0x863   :  { %2460 = vrcp.f32 %v796_v40 }
 0x86c   :  { %v2459_v41 = vpop.eup %2458 }
 0x86d   :  { %v2461_v42 = vpop.eup %2460  ;;  %v3157_v43 = vmul.f32 %v2459_v41, %v3142_v4 }
 0x86e   :  { %v3160_v44 = vmul.f32 %v2461_v42, %v3146_v5 }
 0x86f   :  { %v803_v45 = vpack.c.bf16 %v3157_v43, %v3157_v43 }
 0x870   :  { %v802_v46 = vpack.c.bf16 %v3160_v44, %v3160_v44 }
 0x871   :  { %2287 = vmatmul.mubr.msk.bf16.vlgmr.msra.gmra.mrb[20].mxu0 %vm146_vm0, %v803_v45  ;;  %v848_v47 = vsel %vm146_vm0, %v803_v45, 0 }
 0x872   :  { %2281 = vmatmul.mubr.msk.bf16.vlgmr.msra.gmra.mrb[16].mxu1 %vm146_vm0, %v802_v46  ;;  %2297 = vmatpush3.bf16.xpose.msra.mxu0 %v848_v47  ;;  %v805_v48 = vsel %vm146_vm0, %v802_v46, 0 }
 0x873   :  { %2291 = vmatpush3.bf16.xpose.msra.mxu1 %v805_v48  ;;  %2298 = vmatprep.mubr.msk.bf16.mxu0 %vm2865_vm1, %v2864_v28 }
 0x874   :  { %2292 = vmatprep.mubr.msk.bf16.mxu1 %vm2865_vm1, %v2864_v28  ;;  %2308 = vmatprep.subr.bf16.mxu0 %v2864_v28 }
 0x875   :  { %2302 = vmatprep.subr.bf16.mxu1 %v2864_v28 }
 0x879   :  { %2299 = vmatmul.mubr.msk.bf16.vlgmr.msra.gmra.mrb[24].mxu0 %vm146_vm0, %v3063_v8 }
 0x87a   :  { %2293 = vmatmul.mubr.msk.bf16.vlgmr.msra.gmra.mrb[20].mxu1 %vm146_vm0, %v3065_v9  ;;  %2310 = vmatprep.mubr.msk.bf16.mxu0 %vm2865_vm1, %v2864_v28 }
 0x87b   :  { %2304 = vmatprep.mubr.msk.bf16.mxu1 %vm2865_vm1, %v2864_v28 }
 0x944   :  { %v884_v49 = vpop.f32.mrb[20].mxu0 }
 0x945   :  { %v891_v50 = vmul.f32 5.0, %v884_v49  ;;  %v841_v51 = vpop.f32.mrb[16].mxu1  ;;  %v2288_v52 = vpop.f32.mrb[21].mxu0 }
 0x946   :  { %v890_v53 = vmul.f32 5.0, %v841_v51  ;;  %v2282_v54 = vpop.f32.mrb[17].mxu1  ;;  %v887_v55 = vpop.f32.mrb[22].mxu0 }
 0x947   :  { %v899_v56 = vsel %vm377_vm12, %v891_v50, -inf  ;;  %v844_v57 = vpop.f32.mrb[18].mxu1  ;;  %v2289_v8 = vpop.f32.mrb[23].mxu0 }
 0x948   :  { %v900_v58 = vrot.slane %v899_v56, 4  ;;  %v892_v9 = vsel %vm377_vm12, %v890_v53, -inf  ;;  %v2283_v59 = vpop.f32.mrb[19].mxu1 }
 0x949   :  { %v893_v60 = vrot.slane %v892_v9, 4 }
 0x94a   :  { %v901_v61 = vmax.f32 %v899_v56, %v900_v58 }
 0x94b   :  { %v894_v62 = vmax.f32 %v892_v9, %v893_v60 }
 0x94c   :  { %v902_v63 = vrot.slane %v901_v61, 2  ;;  %v1019_v0 = vpop.f32.mrb[24].mxu0 }
 0x94d   :  { %v895_v1 = vrot.slane %v894_v62, 2  ;;  %v978_v2 = vpop.f32.mrb[20].mxu1  ;;  %v2300_v3 = vpop.f32.mrb[25].mxu0  ;;  %v1028_v24 = vmul.f32 5.0, %v1019_v0 }
 0x94e   :  { %v903_v6 = vmax.f32 %v901_v61, %v902_v63  ;;  %v1026_v7 = vmul.f32 5.0, %v978_v2  ;;  %v2294_v11 = vpop.f32.mrb[21].mxu1  ;;  %v1022_v16 = vpop.f32.mrb[26].mxu0 }
 0x94f   :  { %v896_v18 = vmax.f32 %v894_v62, %v895_v1  ;;  %v981_v21 = vpop.f32.mrb[22].mxu1  ;;  %v2301_v22 = vpop.f32.mrb[27].mxu0  ;;  %v1029_v31 = vmul.f32 5.0, %v1022_v16  ;;  %v1037_v35 = vsel %vm1030_vm7, %v1028_v24, -inf }
 0x950   :  { %v904_v23 = vrot.slane %v903_v6, 1  ;;  %v1027_v25 = vmul.f32 5.0, %v981_v21  ;;  %v2295_v26 = vpop.f32.mrb[23].mxu1  ;;  %v1031_v27 = vsel %vm1030_vm7, %v1026_v7, -inf }
 0x951   :  { %v897_v29 = vrot.slane %v896_v18, 1  ;;  %1032 = vmax.xlane.f32.xlu1 %v1031_v27  ;;  %v1040_v38 = vsel %vm1030_vm7, %v1029_v31, -inf }
 0x952   :  { %v905_v30 = vmax.f32 %v903_v6, %v904_v23  ;;  %v1034_v32 = vsel %vm1030_vm7, %v1027_v25, -inf }
 0x953   :  { %v898_v33 = vmax.f32 %v896_v18, %v897_v29  ;;  %1035 = vmax.xlane.f32.xlu0 %v1034_v32 }
 0x954   :  { %v907_v34 = vsub.f32 %v891_v50, %v905_v30 }
 0x955   :  { %v906_v36 = vsub.f32 %v890_v53, %v898_v33  ;;  %1038 = vmax.xlane.f32.xlu1 %v1037_v35 }
 0x956   :  { %v910_v37 = vmul.f32 1.442695, %v907_v34 }
 0x957   :  { %v908_v39 = vmul.f32 1.442695, %v906_v36  ;;  %1041 = vmax.xlane.f32.xlu0 %v1040_v38 }
 0x958   :  { %2462 = vpow2.f32 %v910_v37 }
 0x959   :  { %2464 = vpow2.f32 %v908_v39 }
 0x962   :  { %v2463_v40 = vpop.eup %2462 }
 0x963   :  { %v2465_v41 = vpop.eup %2464  ;;  %v919_v42 = vsel %vm377_vm12, %v2463_v40, 0.0 }
 0x964   :  { %v920_v45 = vrot.slane %v919_v42, 4  ;;  %v912_v46 = vsel %vm377_vm12, %v2465_v41, 0.0 }
 0x965   :  { %v913_v47 = vrot.slane %v912_v46, 4 }
 0x966   :  { %v921_v48 = vadd.f32 %v920_v45, %v919_v42 }
 0x967   :  { %v914_v49 = vadd.f32 %v913_v47, %v912_v46 }
 0x968   :  { %v922_v50 = vrot.slane %v921_v48, 2 }
 0x969   :  { %v915_v51 = vrot.slane %v914_v49, 2 }
 0x96a   :  { %v923_v52 = vadd.f32 %v922_v50, %v921_v48 }
 0x96b   :  { %v916_v53 = vadd.f32 %v915_v51, %v914_v49 }
 0x96c   :  { %v924_v54 = vrot.slane %v923_v52, 1 }
 0x96d   :  { %v917_v55 = vrot.slane %v916_v53, 1 }
 0x96e   :  { %v925_v56 = vadd.f32 %v924_v54, %v923_v52 }
 0x96f   :  { %v918_v57 = vadd.f32 %v917_v55, %v916_v53  ;;  %v1195_v53 = vpack.c.bf16 %v3146_v5, %v3146_v5 }
 0x970   :  { %2466 = vrcp.f32 %v925_v56 }
 0x971   :  { %2468 = vrcp.f32 %v918_v57 }
 0x97a   :  { %v2467_v8 = vpop.eup %2466 }
 0x97b   :  { %v2469_v58 = vpop.eup %2468  ;;  %v929_v9 = vmul.f32 %v2467_v8, %v2463_v40 }
 0x97c   :  { %v927_v59 = vmul.f32 %v2469_v58, %v2465_v41  ;;  %v1198_v58 = vsel %vm1080_vm8, %v1195_v53, 0 }
 0x97d   :  { %v933_v60 = vsel %vm377_vm12, %v929_v9, 0.0 }
 0x97e   :  { %934 = vadd.xlane.f32.xlu0 %v933_v60  ;;  %v930_v61 = vsel %vm377_vm12, %v927_v59, 0.0 }
 0x97f   :  { %931 = vadd.xlane.f32.xlu1 %v930_v61  ;;  %v1315_v61 = vld [vmem:[#allocation11] sm:$0x1] }
 0x9de   :  { %v1033_v62 = vpop.xlane.xlu1 %1032 }
 0x9df   :  { %v1043_v63 = vsub.f32 %v1026_v7, %v1033_v62  ;;  %v1317_v62 = vpack.c.bf16 %v1315_v61, %v1315_v61 }
 0x9e0   :  { %v1036_v0 = vpop.xlane.xlu0 %1035 }
 0x9e1   :  { %v1047_v1 = vmul.f32 1.442695, %v1043_v63  ;;  %v1044_v2 = vsub.f32 %v1027_v25, %v1036_v0 }
 0x9e2   :  { %v1039_v3 = vpop.xlane.xlu1 %1038 }
 0x9e3   :  { %2470 = vpow2.f32 %v1047_v1  ;;  %v1049_v6 = vmul.f32 1.442695, %v1044_v2  ;;  %v1045_v11 = vsub.f32 %v1028_v24, %v1039_v3 }
 0x9e4   :  { %v1042_v16 = vpop.xlane.xlu0 %1041 }
 0x9e5   :  { %2472 = vpow2.f32 %v1049_v6  ;;  %v1051_v18 = vmul.f32 1.442695, %v1045_v11  ;;  %v1046_v21 = vsub.f32 %v1029_v31, %v1042_v16 }
 0x9e7   :  { %2474 = vpow2.f32 %v1051_v18  ;;  %v1053_v22 = vmul.f32 1.442695, %v1046_v21 }
 0x9e9   :  { %2476 = vpow2.f32 %v1053_v22 }
 0x9ed   :  { %v2471_v23 = vpop.eup %2470 }
 0x9ee   :  { %v1055_v26 = vsel %vm1030_vm7, %v2471_v23, 0.0 }
 0x9ef   :  { %v2473_v27 = vpop.eup %2472  ;;  %1056 = vadd.xlane.f32.xlu1 %v1055_v26 }
 0x9f0   :  { %v1058_v7 = vsel %vm1030_vm7, %v2473_v27, 0.0 }
 0x9f1   :  { %v2475_v29 = vpop.eup %2474  ;;  %1059 = vadd.xlane.f32.xlu0 %v1058_v7 }
 0x9f2   :  { %v1061_v25 = vsel %vm1030_vm7, %v2475_v29, 0.0 }
 0x9f3   :  { %v2477_v30 = vpop.eup %2476  ;;  %1062 = vadd.xlane.f32.xlu1 %v1061_v25 }
 0x9f4   :  { %v1064_v24 = vsel %vm1030_vm7, %v2477_v30, 0.0 }
 0x9f5   :  { %1065 = vadd.xlane.f32.xlu0 %v1064_v24 }
 0xa0b   :  { %v935_v31 = vpop.xlane.xlu0 %934 }
 0xa0c   :  { %v937_v32 = vadd.f32 1e-09, %v935_v31  ;;  %v932_v33 = vpop.xlane.xlu1 %931 }
 0xa0d   :  { %v936_v34 = vadd.f32 1e-09, %v932_v33 }
 0xa0e   :  { %2478 = vrcp.f32 %v937_v32 }
 0xa0f   :  { %2480 = vrcp.f32 %v936_v34 }
 0xa18   :  { %v2479_v35 = vpop.eup %2478 }
 0xa19   :  { %v2481_v36 = vpop.eup %2480  ;;  %v941_v37 = vmul.f32 %v2479_v35, %v929_v9  ;;  %v1196_v9 = vpack.c.bf16 %v3142_v4, %v3142_v4  ;;  %v3220_v4 = vld [vmem:[#allocation10] sm:$0x1f] }
 0xa1a   :  { %v939_v38 = vmul.f32 %v2481_v36, %v927_v59  ;;  %v1316_v60 = vpack.c.bf16 %v3220_v4, %v3220_v4 }
 0xa1b   :  { %v943_v39 = vpack.c.bf16 %v941_v37, %v941_v37  ;;  %v1242_v5 = vsel %vm1080_vm8, %v1196_v9, 0 }
 0xa1c   :  { %v942_v40 = vpack.c.bf16 %v939_v38, %v939_v38 }
 0xa1d   :  { %v1129_v41 = vsel %vm1080_vm8, %v943_v39, 0 }
 0xa1e   :  { %2309 = vmatpush3.bf16.msra.mxu0 %v1129_v41  ;;  %v1082_v42 = vsel %vm1080_vm8, %v942_v40, 0 }
 0xa1f   :  { %2303 = vmatpush3.bf16.msra.mxu1 %v1082_v42  ;;  %2320 = vmatprep.subr.bf16.mxu0 %v2864_v28 }
 0xa20   :  { %2314 = vmatprep.subr.bf16.mxu1 %v2864_v28 }
 0xa7c   :  { %v1057_v45 = vpop.xlane.xlu1 %1056 }
 0xa7d   :  { %2482 = vrcp.f32 %v1057_v45 }
 0xa7e   :  { %v1060_v46 = vpop.xlane.xlu0 %1059 }
 0xa7f   :  { %2484 = vrcp.f32 %v1060_v46 }
 0xa80   :  { %v1063_v47 = vpop.xlane.xlu1 %1062 }
 0xa81   :  { %2486 = vrcp.f32 %v1063_v47 }
 0xa82   :  { %v1066_v48 = vpop.xlane.xlu0 %1065 }
 0xa83   :  { %2488 = vrcp.f32 %v1066_v48 }
 0xa87   :  { %v2483_v49 = vpop.eup %2482 }
 0xa88   :  { %v1068_v51 = vmul.f32 %v2483_v49, %v2471_v23 }
 0xa89   :  { %v2485_v50 = vpop.eup %2484 }
 0xa8a   :  { %v1070_v52 = vmul.f32 %v2485_v50, %v2473_v27 }
 0xa8b   :  { %v2487_v54 = vpop.eup %2486 }
 0xa8c   :  { %v1075_v55 = vpack.c.bf16 %v1070_v52, %v1068_v51  ;;  %v1072_v57 = vmul.f32 %v2487_v54, %v2475_v29 }
 0xa8d   :  { %v2489_v56 = vpop.eup %2488 }
 0xa8e   :  { %v1074_v8 = vmul.f32 %v2489_v56, %v2477_v30  ;;  %2305 = vmatmul.mubr.msk.bf16.vlgmr.msra.gmra.mrb[24].mxu1 %vm1030_vm7, %v1075_v55 }
 0xa8f   :  { %2315 = vmatpush3.bf16.msra.mxu1 %v1198_v58  ;;  %2316 = vmatprep.mubr.msk.bf16.mxu1 %vm2865_vm1, %v2864_v28 }
 0xa90   :  { %v1076_v59 = vpack.c.bf16 %v1074_v8, %v1072_v57  ;;  %2326 = vmatprep.subr.bf16.mxu1 %v2864_v28 }
 0xa92   :  { %2311 = vmatmul.mubr.msk.bf16.vlgmr.msra.gmra.mrb[28].mxu0 %vm1030_vm7, %v1076_v59 }
 0xa93   :  { %2321 = vmatpush3.bf16.msra.mxu0 %v1242_v5  ;;  %2322 = vmatprep.mubr.msk.bf16.mxu0 %vm2865_vm1, %v2864_v28 }
 0xa94   :  { %2332 = vmatprep.subr.bf16.mxu0 %v2864_v28 }
 0xa96   :  { %2317 = vmatmul.mubr.msk.bf16.vlgmr.msra.gmra.mrb[28].mxu1 %vm1030_vm7, %v1075_v55 }
 0xa97   :  { %2328 = vmatprep.mubr.msk.bf16.mxu1 %vm2865_vm1, %v2864_v28 }
 0xa98   :  { %2327 = vmatpush3.bf16.xpose.msra.mxu1 %v3074_v14 }
 0xa99   :  { %2338 = vmatprep.subr.bf16.mxu1 %v2864_v28 }
 0xa9a   :  { %2323 = vmatmul.mubr.msk.bf16.vlgmr.msra.gmra.mrb[32].mxu0 %vm1030_vm7, %v1076_v59 }
 0xa9b   :  { %2334 = vmatprep.mubr.msk.bf16.mxu0 %vm2865_vm1, %v2864_v28 }
 0xa9c   :  { %2333 = vmatpush3.bf16.xpose.msra.mxu0 %v3069_v12 }
 0xa9d   :  { %2344 = vmatprep.subr.bf16.mxu0 %v2864_v28 }
 0xa9f   :  { %2329 = vmatmul.mubr.msk.bf16.vlgmr.msra.gmra.mrb[32].mxu1 %vm146_vm0, %v1316_v60 }
 0xaa0   :  { %2339 = vmatpush3.bf16.xpose.msra.mxu1 %v3074_v14  ;;  %2340 = vmatprep.mubr.msk.bf16.mxu1 %vm2865_vm1, %v2864_v28 }
 0xaa1   :  { %2350 = vmatprep.subr.bf16.mxu1 %v2864_v28 }
 0xaa3   :  { %2335 = vmatmul.mubr.msk.bf16.vlgmr.msra.gmra.mrb[36].mxu0 %vm146_vm0, %v1316_v60 }
 0xaa4   :  { %2345 = vmatpush3.bf16.xpose.msra.mxu0 %v3069_v12  ;;  %2346 = vmatprep.mubr.msk.bf16.mxu0 %vm2865_vm1, %v2864_v28  ;;  %v1172_v12 = vlaneseq }
 0xaa5   :  { %2356 = vmatprep.subr.bf16.mxu0 %v2864_v28 }
 0xaa6   :  { %v3250_v14 = vshrl.u32 %v1172_v12, 7  ;;  %v1176_v63 = vand.u32 127, %v1172_v12 }
 0xaa7   :  { %2341 = vmatmul.mubr.msk.bf16.vlgmr.msra.gmra.mrb[36].mxu1 %vm146_vm0, %v1317_v62 }
 0xaa8   :  { %2351 = vmatpush3.bf16.msra.mxu1 %v3087_v20  ;;  %2352 = vmatprep.mubr.msk.bf16.mxu1 %vm2865_vm1, %v2864_v28  ;;  %v1174_v0 = vadd.s32 8, %v3250_v14  ;;  %vm1177_vm9 = vcmp.eq.s32.totalorder %v3250_v14, %v1176_v63 }
 0xaa9   :  { %2362 = vmatprep.subr.bf16.mxu1 %v2864_v28  ;;  %v2140_v2 = vsel %vm1177_vm9, 1.0, %v2864_v28 }
 0xaaa   :  { %vm1178_vm10 = vcmp.eq.s32.totalorder %v1174_v0, %v1176_v63 }
 0xaab   :  { %2347 = vmatmul.mubr.msk.bf16.vlgmr.msra.gmra.mrb[40].mxu0 %vm146_vm0, %v1317_v62  ;;  %v2141_v16 = vsel %vm1178_vm10, 1.0, %v2864_v28 }
 0xaac   :  { %2357 = vmatpush3.bf16.msra.mxu0 %v3082_v19  ;;  %2358 = vmatprep.mubr.msk.bf16.mxu0 %vm2865_vm1, %v2864_v28 }
 0xaad   :  { %2368 = vmatprep.subr.bf16.mxu0 %v2864_v28 }
 0xb61   :  { %v1118_v1 = vpop.f32.mrb[24].mxu1 }
 0xb62   :  { %v1183_v3 = vmul.f32 0.25, %v1118_v1  ;;  %v2306_v6 = vpop.f32.mrb[25].mxu1 }
 0xb63   :  { %v1121_v11 = vpop.f32.mrb[26].mxu1 }
 0xb64   :  { %v1187_v18 = vsub.f32 %v2140_v2, %v1183_v3  ;;  %v1184_v21 = vmul.f32 0.25, %v1121_v11  ;;  %v2307_v22 = vpop.f32.mrb[27].mxu1 }
 0xb65   :  { %v1165_v23 = vpop.f32.mrb[28].mxu0 }
 0xb66   :  { %1191 = vst.msk [vmem:[#allocation16] sm:$0xff] %vm377_vm12, %v1187_v18  ;;  %v1188_v26 = vsub.f32 %v2141_v16, %v1184_v21  ;;  %v1185_v27 = vmul.f32 0.25, %v1165_v23  ;;  %v2312_v7 = vpop.f32.mrb[29].mxu0 }
 0xb67   :  { %v1168_v29 = vpop.f32.mrb[30].mxu0 }
 0xb68   :  { %1192 = vst.msk [vmem:[#allocation16 + $0x8] sm:$0xff] %vm377_vm12, %v1188_v26  ;;  %v1189_v25 = vsub.f32 %v2140_v2, %v1185_v27  ;;  %v1186_v30 = vmul.f32 0.25, %v1168_v29  ;;  %v2313_v24 = vpop.f32.mrb[31].mxu0 }
 0xb69   :  { %v1234_v31 = vpop.f32.mrb[28].mxu1 }
 0xb6a   :  { %1193 = vst.msk [vmem:[#allocation16 + $0x10] sm:$0xff] %vm377_vm12, %v1189_v25  ;;  %v1190_v32 = vsub.f32 %v2141_v16, %v1186_v30  ;;  %v1285_v33 = vmul.f32 0.5, %v1234_v31  ;;  %v2318_v34 = vpop.f32.mrb[29].mxu1 }
 0xb6b   :  { %v1237_v35 = vpop.f32.mrb[30].mxu1 }
 0xb6c   :  { %1194 = vst.msk [vmem:[#allocation16 + $0x18] sm:$0xff] %vm377_vm12, %v1190_v32  ;;  %v1289_v36 = vadd.f32 %v1285_v33, %v3022_v13  ;;  %v1286_v37 = vmul.f32 0.5, %v1237_v35  ;;  %v2319_v38 = vpop.f32.mrb[31].mxu1 }
 0xb6d   :  { %v1278_v39 = vpop.f32.mrb[32].mxu0 }
 0xb6e   :  { %v2163_v40 = vpack.c.bf16 %v1289_v36, %v1289_v36  ;;  %v1290_v41 = vadd.f32 %v1286_v37, %v3032_v17  ;;  %v1287_v42 = vmul.f32 0.5, %v1278_v39  ;;  %v2324_v45 = vpop.f32.mrb[33].mxu0 }
 0xb6f   :  { %v1281_v46 = vpop.f32.mrb[34].mxu0 }
 0xb70   :  { %1310 = vst.msk [vmem:[#allocation17] sm:$0xf] %vm1309_vm11, %v2163_v40  ;;  %v2164_v47 = vpack.c.bf16 %v1290_v41, %v1290_v41  ;;  %v1291_v48 = vadd.f32 %v1287_v42, %v3020_v10  ;;  %v1288_v49 = vmul.f32 0.5, %v1281_v46  ;;  %v2325_v50 = vpop.f32.mrb[35].mxu0 }
 0xb72   :  { %1311 = vst.msk [vmem:[#allocation17 + $0x4] sm:$0xf] %vm1309_vm11, %v2164_v47  ;;  %v2165_v13 = vpack.c.bf16 %v1291_v48, %v1291_v48  ;;  %v1292_v51 = vadd.f32 %v1288_v49, %v3026_v15  ;;  %v1355_v52 = vpop.f32.mrb[32].mxu1 }
 0xb73   :  { %v2330_v53 = vpop.f32.mrb[33].mxu1  ;;  %v2154_v55 = vmul.f32 -20.0, %v1355_v52  ;;  %v1401_v25 = vmul.f32 20.0, %v1355_v52 }
 0xb74   :  { %1312 = vst.msk [vmem:[#allocation17 + $0x8] sm:$0xf] %vm1309_vm11, %v2165_v13  ;;  %v2166_v17 = vpack.c.bf16 %v1292_v51, %v1292_v51  ;;  %v1358_v54 = vpop.f32.mrb[34].mxu1 }
 0xb75   :  { %v2331_v56 = vpop.f32.mrb[35].mxu1  ;;  %v1502_v58 = vmul.f32 1.442695, %v2154_v55 }
 0xb76   :  { %1313 = vst.msk [vmem:[#allocation17 + $0xc] sm:$0xf] %vm1309_vm11, %v2166_v17  ;;  %v1395_v57 = vpop.f32.mrb[36].mxu0  ;;  %v1894_v17 = vld [vmem:[#allocation10] sm:$0x1f] }
 0xb77   :  { %v2336_v8 = vpop.f32.mrb[37].mxu0  ;;  %v2155_v9 = vmul.f32 -20.0, %v1395_v57  ;;  %2490 = vpow2.f32 %v1502_v58  ;;  %v1402_v34 = vmul.f32 20.0, %v1395_v57 }
 0xb78   :  { %v1398_v10 = vpop.f32.mrb[38].mxu0 }
 0xb79   :  { %v2337_v59 = vpop.f32.mrb[39].mxu0  ;;  %v1504_v62 = vmul.f32 1.442695, %v2155_v9 }
 0xb7a   :  { %v1440_v5 = vpop.f32.mrb[36].mxu1 }
 0xb7b   :  { %v2152_v60 = vmul.f32 -20.0, %v1440_v5  ;;  %v2342_v61 = vpop.f32.mrb[37].mxu1 }
 0xb7c   :  { %v1443_v15 = vpop.f32.mrb[38].mxu1 }
 0xb7d   :  { %v1490_v12 = vmul.f32 1.442695, %v2152_v60  ;;  %v2343_v63 = vpop.f32.mrb[39].mxu1 }
 0xb7e   :  { %v1480_v0 = vpop.f32.mrb[40].mxu0 }
 0xb7f   :  { %2492 = vpow2.f32 %v1490_v12  ;;  %v2153_v1 = vmul.f32 -20.0, %v1480_v0  ;;  %v2348_v2 = vpop.f32.mrb[41].mxu0 }
 0xb80   :  { %v1483_v3 = vpop.f32.mrb[42].mxu0  ;;  %2494 = vpow2.f32 %v1504_v62 }
 0xb81   :  { %v1492_v6 = vmul.f32 1.442695, %v2153_v1  ;;  %v2349_v11 = vpop.f32.mrb[43].mxu0  ;;  %v2491_v16 = vpop.eup %2490 }
 0xb82   :  { %v1506_v21 = vadd.f32 1.0, %v2491_v16 }
 0xb83   :  { %2496 = vpow2.f32 %v1492_v6 }
 0xb89   :  { %v2493_v18 = vpop.eup %2492 }
 0xb8a   :  { %v1494_v22 = vadd.f32 1.0, %v2493_v18  ;;  %v2495_v23 = vpop.eup %2494 }
 0xb8b   :  { %v1507_v27 = vadd.f32 1.0, %v2495_v23 }
 0xb8c   :  { %2498 = vrcp.f32 %v1494_v22 }
 0xb8d   :  { %v2497_v26 = vpop.eup %2496  ;;  %2500 = vrcp.f32 %v1506_v21 }
 0xb8e   :  { %v1495_v7 = vadd.f32 1.0, %v2497_v26 }
 0xb90   :  { %2502 = vrcp.f32 %v1495_v7 }
 0xb91   :  { %2504 = vrcp.f32 %v1507_v27 }
 0xb96   :  { %v2499_v29 = vpop.eup %2498 }
 0xb97   :  { %v1526_v30 = vsel %vm1525_vm13, %v2499_v29, 0.0  ;;  %v1802_v24 = vrot.slane %v2499_v29, 3  ;;  %v2501_v31 = vpop.eup %2500 }
 0xb98   :  { %1527 = vadd.xlane.f32.xlu1 %v1526_v30  ;;  %v1513_v36 = vsel %vm1512_vm2, %v2501_v31, 0.0 }
 0xb99   :  { %v1807_v32 = vsel %vm1806_vm14, %v1401_v25, %v1802_v24 }
 0xb9a   :  { %v2503_v33 = vpop.eup %2502  ;;  %1810 = vst.msk [vmem:[#allocation19] sm:$0x3f] %vm1809_vm15, %v1807_v32 }
 0xb9b   :  { %v1529_v35 = vsel %vm1525_vm13, %v2503_v33, 0.0  ;;  %v1803_v37 = vrot.slane %v2503_v33, 3  ;;  %v2505_v38 = vpop.eup %2504 }
 0xb9c   :  { %1530 = vadd.xlane.f32.xlu0 %v1529_v35  ;;  %1514 = vadd.xlane.f32.xlu1 %v1513_v36  ;;  %v1516_v40 = vsel %vm1512_vm2, %v2505_v38, 0.0 }
 0xb9d   :  { %v1808_v39 = vsel %vm1806_vm14, %v1402_v34, %v1803_v37 }
 0xb9e   :  { %1811 = vst.msk [vmem:[#allocation19 + $0x8] sm:$0x3f] %vm1809_vm15, %v1808_v39 }
 0xba0   :  { %1517 = vadd.xlane.f32.xlu0 %v1516_v40 }
 0xc25   :  { %v1528_v41 = vpop.xlane.xlu1 %1527 }
 0xc26   :  { %v1532_v42 = vadd.f32 1e-05, %v1528_v41 }
 0xc28   :  { %2506 = vrcp.f32 %v1532_v42 }
 0xc29   :  { %v1531_v45 = vpop.xlane.xlu0 %1530  ;;  %v1515_v46 = vpop.xlane.xlu1 %1514 }
 0xc2a   :  { %v1533_v47 = vadd.f32 1e-05, %v1531_v45  ;;  %v1519_v48 = vadd.f32 1e-05, %v1515_v46 }
 0xc2c   :  { %2508 = vrcp.f32 %v1533_v47 }
 0xc2d   :  { %2510 = vrcp.f32 %v1519_v48  ;;  %v1518_v49 = vpop.xlane.xlu0 %1517 }
 0xc2e   :  { %v1520_v50 = vadd.f32 1e-05, %v1518_v49 }
 0xc30   :  { %2512 = vrcp.f32 %v1520_v50 }
 0xc32   :  { %v2507_v13 = vpop.eup %2506 }
 0xc33   :  { %v1535_v51 = vmul.f32 %v2507_v13, %v2499_v29 }
 0xc35   :  { %v1538_v52 = vpack.c.bf16 %v1535_v51, %v1535_v51 }
 0xc36   :  { %v2509_v53 = vpop.eup %2508 }
 0xc37   :  { %v2511_v54 = vpop.eup %2510  ;;  %v1537_v55 = vmul.f32 %v2509_v53, %v2503_v33  ;;  %2353 = vmatmul.mubr.msk.bf16.vlgmr.msra.gmra.mrb[40].mxu1 %vm377_vm12, %v1538_v52 }
 0xc38   :  { %2363 = vmatpush3.bf16.msra.mxu1 %v3087_v20  ;;  %2364 = vmatprep.mubr.msk.bf16.mxu1 %vm2865_vm1, %v2864_v28  ;;  %v1522_v56 = vmul.f32 %v2511_v54, %v2501_v31 }
 0xc39   :  { %v1539_v57 = vpack.c.bf16 %v1537_v55, %v1537_v55  ;;  %2374 = vmatprep.subr.msk.mxu1 %vm146_vm0, %v1894_v17 }
 0xc3a   :  { %v2513_v8 = vpop.eup %2512  ;;  %v1626_v58 = vpack.c.bf16 %v1522_v56, %v1522_v56 }
 0xc3b   :  { %2359 = vmatmul.mubr.msk.bf16.vlgmr.msra.gmra.mrb[44].mxu0 %vm377_vm12, %v1539_v57  ;;  %v1524_v10 = vmul.f32 %v2513_v8, %v2505_v38 }
 0xc3c   :  { %2369 = vmatpush3.bf16.msra.mxu0 %v3082_v19  ;;  %2370 = vmatprep.mubr.msk.bf16.mxu0 %vm2865_vm1, %v2864_v28  ;;  %vm1981_vm1 = vcmask 39936  }
 0xc3d   :  { %v1627_v20 = vpack.c.bf16 %v1524_v10, %v1524_v10 }
 0xc3f   :  { %2365 = vmatmul.mubr.msk.bf16.vlgmr.msra.gmra.mrb[44].mxu1 %vm377_vm12, %v1626_v58  ;;  %v1745_v58 = vsub.s32 0, %v3250_v14 }
 0xc40   :  { %2376 = vmatprep.mubr.msk.f32.mxu1 %vm146_vm0, %v3160_v44 }
 0xc41   :  { %2375 = vmatpush3.xpose.msk.msra.mxu1 %vm146_vm0, %v1894_v17 }
 0xc43   :  { %2371 = vmatmul.mubr.msk.bf16.vlgmr.msra.gmra.mrb[48].mxu0 %vm377_vm12, %v1627_v20 }
 0xc47   :  { %2377 = vmatmul.mubr.msk.f32.vlgmr.msra.gmra.mrb[48].mxu1 %vm146_vm0, %v3157_v43  ;;  %vm1753_vm0 = vcmask 258048  }
 0xd0a   :  { %v3286_v9 = vpop.f32.mrb[40].mxu1 }
 0xd0b   :  { %v1714_v28 = vmul.f32 %v3286_v9, %v3286_v9  ;;  %v2354_v19 = vpop.f32.mrb[41].mxu1 }
 0xd0c   :  { %v1580_v59 = vpop.f32.mrb[42].mxu1 }
 0xd0d   :  { %v2355_v5 = vpop.f32.mrb[43].mxu1  ;;  %v1717_v60 = vsel %vm1716_vm3, %v1714_v28, 0.0 }
 0xd0e   :  { %v3290_v61 = vpop.f32.mrb[44].mxu0  ;;  %1718 = vadd.xlane.f32.xlu1 %v1717_v60 }
 0xd0f   :  { %v1715_v44 = vmul.f32 %v3290_v61, %v3290_v61  ;;  %v2360_v15 = vpop.f32.mrb[45].mxu0 }
 0xd10   :  { %v1623_v62 = vpop.f32.mrb[46].mxu0 }
 0xd11   :  { %v2361_v12 = vpop.f32.mrb[47].mxu0  ;;  %v1720_v43 = vsel %vm1716_vm3, %v1715_v44, 0.0 }
 0xd12   :  { %1721 = vadd.xlane.f32.xlu0 %v1720_v43  ;;  %v3294_v63 = vpop.f32.mrb[44].mxu1 }
 0xd13   :  { %v1762_v0 = vmul.f32 %v3294_v63, %v3294_v63  ;;  %v2366_v1 = vpop.f32.mrb[45].mxu1 }
 0xd14   :  { %v1668_v2 = vpop.f32.mrb[46].mxu1 }
 0xd15   :  { %v2367_v3 = vpop.f32.mrb[47].mxu1  ;;  %v1764_v6 = vsel %vm1753_vm0, %v1762_v0, 0.0 }
 0xd16   :  { %v3299_v11 = vpop.f32.mrb[48].mxu0  ;;  %1765 = vadd.xlane.f32.xlu1 %v1764_v6 }
 0xd17   :  { %v1763_v16 = vmul.f32 %v3299_v11, %v3299_v11  ;;  %v2372_v18 = vpop.f32.mrb[49].mxu0 }
 0xd18   :  { %v1711_v21 = vpop.f32.mrb[50].mxu0 }
 0xd19   :  { %v2373_v22 = vpop.f32.mrb[51].mxu0  ;;  %v1767_v23 = vsel %vm1753_vm0, %v1763_v16, 0.0 }
 0xd1a   :  { %1768 = vadd.xlane.f32.xlu0 %v1767_v23  ;;  %v2378_v26 = vpop.f32.mrb[48].mxu1 }
 0xd1b   :  { %v1980_v27 = vmul.f32 20.0, %v2378_v26  ;;  %v1970_v7 = vpop.f32.mrb[49].mxu1 }
 0xd1c   :  { %v1979_v29 = vmul.f32 20.0, %v1970_v7 }
 0xd1d   :  { %v1985_v25 = vsel %vm1981_vm1, %v1980_v27, -inf }
 0xd1e   :  { %1986 = vmax.xlane.f32.xlu0 %v1985_v25  ;;  %v1982_v30 = vsel %vm1981_vm1, %v1979_v29, -inf }
 0xd1f   :  { %1983 = vmax.xlane.f32.xlu1 %v1982_v30 }
 0xd9b   :  { %v1719_v24 = vpop.xlane.xlu1 %1718 }
 0xd9c   :  { %2514 = vrsqrt.f32 %v1719_v24  ;;  %vm1725_vm12 = vcmp.eq.f32.partialorder %v1719_v24, inf  ;;  %v1728_v36 = vand.u32 2147483648, %v1719_v24  ;;  %vm1727_vm4 = vcmp.eq.f32.partialorder %v1719_v24, 0.0 }
 0xd9f   :  { %v1722_v31 = vpop.xlane.xlu0 %1721 }
 0xda0   :  { %2516 = vrsqrt.f32 %v1722_v31  ;;  %vm1732_vm5 = vcmp.eq.f32.partialorder %v1722_v31, inf  ;;  %v1735_v42 = vand.u32 2147483648, %v1722_v31  ;;  %vm1734_vm6 = vcmp.eq.f32.partialorder %v1722_v31, 0.0 }
 0xda3   :  { %v1766_v32 = vpop.xlane.xlu1 %1765 }
 0xda4   :  { %2518 = vrsqrt.f32 %v1766_v32  ;;  %vm1772_vm7 = vcmp.eq.f32.partialorder %v1766_v32, inf  ;;  %v1775_v50 = vand.u32 2147483648, %v1766_v32  ;;  %vm1774_vm8 = vcmp.eq.f32.partialorder %v1766_v32, 0.0 }
 0xda6   :  { %v2515_v33 = vpop.eup %2514 }
 0xda7   :  { %v1724_v34 = vmul.f32 %v2515_v33, %v1719_v24  ;;  %v1769_v35 = vpop.xlane.xlu0 %1768 }
 0xda8   :  { %2520 = vrsqrt.f32 %v1769_v35  ;;  %vm1779_vm9 = vcmp.eq.f32.partialorder %v1769_v35, inf  ;;  %v1782_v56 = vand.u32 2147483648, %v1769_v35  ;;  %vm1781_vm10 = vcmp.eq.f32.partialorder %v1769_v35, 0.0 }
 0xda9   :  { %v1726_v37 = vsel %vm1725_vm12, %v1719_v24, %v1724_v34 }
 0xdaa   :  { %v2517_v38 = vpop.eup %2516  ;;  %v1729_v39 = vsel %vm1727_vm4, %v1728_v36, %v1726_v37 }
 0xdab   :  { %v1737_v40 = vadd.f32 1e-09, %v1729_v39  ;;  %v1731_v41 = vmul.f32 %v2517_v38, %v1722_v31  ;;  %v1987_v57 = vpop.xlane.xlu0 %1986 }
 0xdac   :  { %v1984_v13 = vpop.xlane.xlu1 %1983  ;;  %v1989_v19 = vsub.f32 %v1980_v27, %v1987_v57 }
 0xdad   :  { %2522 = vrcp.f32 %v1737_v40  ;;  %v1733_v45 = vsel %vm1732_vm5, %v1722_v31, %v1731_v41  ;;  %v1988_v55 = vsub.f32 %v1979_v29, %v1984_v13 }
 0xdae   :  { %v2519_v46 = vpop.eup %2518  ;;  %v1736_v47 = vsel %vm1734_vm6, %v1735_v42, %v1733_v45  ;;  %v1992_v15 = vmul.f32 1.442695, %v1989_v19 }
 0xdaf   :  { %v1738_v48 = vadd.f32 1e-09, %v1736_v47  ;;  %v1771_v49 = vmul.f32 %v2519_v46, %v1766_v32  ;;  %v1990_v59 = vmul.f32 1.442695, %v1988_v55 }
 0xdb1   :  { %2524 = vrcp.f32 %v1738_v48  ;;  %v1773_v51 = vsel %vm1772_vm7, %v1766_v32, %v1771_v49 }
 0xdb2   :  { %v2521_v52 = vpop.eup %2520  ;;  %v1776_v53 = vsel %vm1774_vm8, %v1775_v50, %v1773_v51 }
 0xdb3   :  { %v1784_v17 = vadd.f32 1e-09, %v1776_v53  ;;  %v1778_v54 = vmul.f32 %v2521_v52, %v1769_v35 }
 0xdb5   :  { %2526 = vrcp.f32 %v1784_v17  ;;  %v1780_v8 = vsel %vm1779_vm9, %v1769_v35, %v1778_v54 }
 0xdb6   :  { %v1783_v10 = vsel %vm1781_vm10, %v1782_v56, %v1780_v8 }
 0xdb7   :  { %v2523_v20 = vpop.eup %2522  ;;  %v1785_v28 = vadd.f32 1e-09, %v1783_v10 }
 0xdb8   :  { %v1740_v5 = vmul.f32 %v2523_v20, %v3286_v9 }
 0xdb9   :  { %2528 = vrcp.f32 %v1785_v28 }
 0xdba   :  { %v1746_v60 = vrot.slane %v1740_v5, %v1745_v58  ;;  %2530 = vpow2.f32 %v1990_v59 }
 0xdbb   :  { %v2525_v44 = vpop.eup %2524  ;;  %2532 = vpow2.f32 %v1992_v15 }
 0xdbc   :  { %v1751_v62 = vmul.f32 %v1746_v60, %v3220_v4  ;;  %v1742_v12 = vmul.f32 %v2525_v44, %v3290_v61 }
 0xdbe   :  { %v1754_v43 = vsel %vm1753_vm0, %v1751_v62, 0.0  ;;  %v1750_v0 = vrot.slane %v1742_v12, %v1745_v58 }
 0xdbf   :  { %v2527_v1 = vpop.eup %2526  ;;  %1755 = vadd.xlane.f32.xlu1 %v1754_v43 }
 0xdc0   :  { %v1752_v14 = vmul.f32 %v1750_v0, %v3220_v4  ;;  %v1787_v2 = vmul.f32 %v2527_v1, %v3294_v63 }
 0xdc2   :  { %v1757_v9 = vsel %vm1753_vm0, %v1752_v14, 0.0  ;;  %v1790_v3 = vmul.f32 %v1787_v2, %v3220_v4 }
 0xdc3   :  { %v2529_v6 = vpop.eup %2528  ;;  %1758 = vadd.xlane.f32.xlu0 %v1757_v9 }
 0xdc4   :  { %v1792_v16 = vsel %vm1753_vm0, %v1790_v3, 0.0  ;;  %v1789_v61 = vmul.f32 %v2529_v6, %v3299_v11  ;;  %v3317_v18 = vpop.eup %2530 }
 0xdc5   :  { %1793 = vadd.xlane.f32.xlu1 %v1792_v16  ;;  %v1994_v63 = vsel %vm1981_vm1, %v3317_v18, 0.0  ;;  %v3323_v23 = vpop.eup %2532 }
 0xdc6   :  { %v1791_v21 = vmul.f32 %v1789_v61, %v3220_v4  ;;  %v1997_v26 = vsel %vm1981_vm1, %v3323_v23, 0.0 }
 0xdc8   :  { %v1795_v22 = vsel %vm1753_vm0, %v1791_v21, 0.0 }
 0xdc9   :  { %1796 = vadd.xlane.f32.xlu0 %v1795_v22  ;;  %1995 = vadd.xlane.f32.xlu1 %v1994_v63 }
 0xdcd   :  { %1998 = vadd.xlane.f32.xlu0 %v1997_v26 }
 0xdce   :  { %2697 = shalt.err (!%p2694_p10)
}
 0xdcf   :  { %s2698_s22 = scalar_lea.hbm %s3472_s7, 256 }
 0xdd0   :  { %p2699_p11 = scmp.ne.s32.totalorder %s3472_s7, %s2698_s22  ;;  %p2702_p12 = scmp.lt.u32.totalorder %s2698_s22, %s3472_s7 }
 0xdd2   :  { %p2704_p13 = pnand %p2702_p12, %p2699_p11 }
 0xdd4   :  { %2707 = shalt.err (!%p2704_p13)
}
 0xdd5   :  { %s2868_s17 = smov 128   ;;  %s2869_s18 = smov 8  }
 0xdd6   :  { %2029 = dma.vmem_to_hbm [thread:$0]  %s2024_s25, 256, %s3472_s7, [#allocation15], %s2868_s17, %s2868_s17, %s2869_s18  }
 0xdd7   :  { %s2708_s30 = scalar_lea.vmem %s3327_s26, 256  ;;  %p2713_p1 = scmp.lt.s32.totalorder %s3327_s26, %s3327_s26 }
 0xdd8   :  { %p2709_p0 = scmp.ne.s32.totalorder %s3327_s26, %s2708_s30  ;;  %p2714_p2 = scmp.lt.s32.totalorder %s2708_s30, %s2708_s30 }
 0xdda   :  { %p2715_p3 = por %p2714_p2, %p2713_p1 }
 0xddc   :  { %p2716_p4 = pnand %p2715_p3, %p2709_p0 }
 0xdde   :  { %2719 = shalt.err (!%p2716_p4)
}
 0xddf   :  { %s2720_s3 = scalar_lea.hbm %s3474_s9, 256 }
 0xde0   :  { %p2721_p5 = scmp.ne.s32.totalorder %s3474_s9, %s2720_s3  ;;  %p2724_p6 = scmp.lt.u32.totalorder %s2720_s3, %s3474_s9 }
 0xde2   :  { %p2726_p7 = pnand %p2724_p6, %p2721_p5 }
 0xde4   :  { %2729 = shalt.err (!%p2726_p7)
}
 0xde5   :  { %2053 = dma.vmem_to_hbm [thread:$0]  %s3327_s26, 256, %s3474_s9, [#allocation18], %s2858_s15, %s2858_s15, %s2859_s16  }
 0xde6   :  { %s2870_s27 = smov [#allocation13]  }
 0xde7   :  { %s2011_s28 = sshll.u32 %s2870_s27, 4  ;;  %s2012_s28 = int_to_ptr.vmem [resolvable:$true] %s2011_s28 }
 0xde8   :  { %s2730_s1 = scalar_lea.vmem %s2012_s28, 512  ;;  %p2735_p9 = scmp.lt.s32.totalorder %s2012_s28, %s2012_s28 }
 0xde9   :  { %p2731_p8 = scmp.ne.s32.totalorder %s2012_s28, %s2730_s1  ;;  %p2736_p10 = scmp.lt.s32.totalorder %s2730_s1, %s2730_s1 }
 0xdeb   :  { %p2737_p11 = por %p2736_p10, %p2735_p9 }
 0xded   :  { %p2738_p12 = pnand %p2737_p11, %p2731_p8 }
 0xdef   :  { %2741 = shalt.err (!%p2738_p12)
}
 0xdf0   :  { %s2742_s14 = scalar_lea.hbm %s3471_s6, 512 }
 0xdf1   :  { %p2743_p13 = scmp.ne.s32.totalorder %s3471_s6, %s2742_s14  ;;  %p2746_p0 = scmp.lt.u32.totalorder %s2742_s14, %s3471_s6 }
 0xdf3   :  { %p2748_p1 = pnand %p2746_p0, %p2743_p13 }
 0xdf5   :  { %2751 = shalt.err (!%p2748_p1)
}
 0xdf6   :  { %2017 = dma.vmem_to_hbm [thread:$0]  %s2012_s28, 512, %s3471_s6, [#allocation4], %s2868_s17, %s2868_s17, %s2869_s18  }
 0xdf7   :  { %s2871_s26 = smov [#allocation16]   ;;  %s2872_s30 = smov [#allocation19]  }
 0xdf8   :  { %s2035_s0 = sshll.u32 %s2871_s26, 4  ;;  %s2059_s20 = sshll.u32 %s2872_s30, 4  ;;  %s2036_s0 = int_to_ptr.vmem [resolvable:$true] %s2035_s0  ;;  %s3379_s20 = int_to_ptr.vmem [resolvable:$true] %s2059_s20 }
 0xdf9   :  { %s2752_s23 = scalar_lea.vmem %s2036_s0, 512  ;;  %p2757_p3 = scmp.lt.s32.totalorder %s2036_s0, %s2036_s0 }
 0xdfa   :  { %p2753_p2 = scmp.ne.s32.totalorder %s2036_s0, %s2752_s23  ;;  %p2758_p4 = scmp.lt.s32.totalorder %s2752_s23, %s2752_s23 }
 0xdfc   :  { %p2759_p5 = por %p2758_p4, %p2757_p3 }
 0xdfe   :  { %p2760_p6 = pnand %p2759_p5, %p2753_p2 }
 0xe00   :  { %2763 = shalt.err (!%p2760_p6)
}
 0xe01   :  { %s2764_s21 = scalar_lea.hbm %s3473_s8, 512 }
 0xe02   :  { %p2765_p7 = scmp.ne.s32.totalorder %s3473_s8, %s2764_s21  ;;  %p2768_p8 = scmp.lt.u32.totalorder %s2764_s21, %s3473_s8 }
 0xe04   :  { %p2770_p9 = pnand %p2768_p8, %p2765_p7 }
 0xe06   :  { %2773 = shalt.err (!%p2770_p9)
}
 0xe07   :  { %2041 = dma.vmem_to_hbm [thread:$0]  %s2036_s0, 512, %s3473_s8, [#allocation15], %s2868_s17, %s2868_s17, %s2869_s18  }
 0xe08   :  { %s2774_s28 = scalar_lea.vmem %s3379_s20, 256  ;;  %p2779_p11 = scmp.lt.s32.totalorder %s3379_s20, %s3379_s20 }
 0xe09   :  { %p2775_p10 = scmp.ne.s32.totalorder %s3379_s20, %s2774_s28  ;;  %p2780_p12 = scmp.lt.s32.totalorder %s2774_s28, %s2774_s28 }
 0xe0b   :  { %p2781_p13 = por %p2780_p12, %p2779_p11 }
 0xe0d   :  { %p2782_p0 = pnand %p2781_p13, %p2775_p10 }
 0xe0f   :  { %2785 = shalt.err (!%p2782_p0)
}
 0xe10   :  { %s2786_s2 = scalar_lea.hbm %s3475_s10, 256 }
 0xe11   :  { %p2787_p1 = scmp.ne.s32.totalorder %s3475_s10, %s2786_s2  ;;  %p2790_p2 = scmp.lt.u32.totalorder %s2786_s2, %s3475_s10 }
 0xe13   :  { %p2792_p3 = pnand %p2790_p2, %p2787_p1 }
 0xe15   :  { %2795 = shalt.err (!%p2792_p3)
}
 0xe16   :  { %2065 = dma.vmem_to_hbm [thread:$0]  %s3379_s20, 256, %s3475_s10, [#allocation18], %s2868_s17, %s2868_s17, %s2869_s18   ;;  %vm1888_vm11 = vcmask 7168   ;;  %vm1891_vm13 = vcmask 12288  }
 0xe17   :  { %s2873_s10 = smov [#allocation20]   ;;  %s2874_s16 = smov [#allocation22]  }
 0xe18   :  { %s2071_s15 = sshll.u32 %s2873_s10, 4  ;;  %s2083_s26 = sshll.u32 %s2874_s16, 4  ;;  %s2072_s15 = int_to_ptr.vmem [resolvable:$true] %s2071_s15  ;;  %s3428_s26 = int_to_ptr.vmem [resolvable:$true] %s2083_s26 }
 0xe19   :  { %s2796_s0 = scalar_lea.vmem %s2072_s15, 256  ;;  %p2801_p5 = scmp.lt.s32.totalorder %s2072_s15, %s2072_s15 }
 0xe1a   :  { %p2797_p4 = scmp.ne.s32.totalorder %s2072_s15, %s2796_s0  ;;  %p2802_p6 = scmp.lt.s32.totalorder %s2796_s0, %s2796_s0 }
 0xe1c   :  { %p2803_p7 = por %p2802_p6, %p2801_p5 }
 0xe1e   :  { %p2804_p8 = pnand %p2803_p7, %p2797_p4 }
 0xe4c   :  { %v1756_v4 = vpop.xlane.xlu1 %1755 }
 0xe4d   :  { %v1760_v11 = vmul.f32 20.0, %v1756_v4 }
 0xe4f   :  { %v1812_v27 = vsel %vm1806_vm14, %v1760_v11, -inf }
 0xe50   :  { %v1813_v7 = vrot.slane %v1812_v27, 4  ;;  %v1759_v29 = vpop.xlane.xlu0 %1758 }
 0xe51   :  { %v1761_v25 = vmul.f32 20.0, %v1759_v29 }
 0xe52   :  { %v1814_v30 = vmax.f32 %v1812_v27, %v1813_v7  ;;  %v1794_v24 = vpop.xlane.xlu1 %1793 }
 0xe53   :  { %v1819_v31 = vsel %vm1806_vm14, %v1761_v25, -inf  ;;  %v1798_v32 = vmul.f32 20.0, %v1794_v24 }
 0xe54   :  { %v1815_v33 = vrot.slane %v1814_v30, 2  ;;  %v1820_v34 = vrot.slane %v1819_v31, 4 }
 0xe55   :  { %v1850_v35 = vsel %vm1806_vm14, %v1798_v32, -inf }
 0xe56   :  { %v1816_v36 = vmax.f32 %v1814_v30, %v1815_v33  ;;  %v1821_v37 = vmax.f32 %v1819_v31, %v1820_v34  ;;  %v1851_v38 = vrot.slane %v1850_v35, 4  ;;  %v1797_v39 = vpop.xlane.xlu0 %1796  ;;  %v1996_v40 = vpop.xlane.xlu1 %1995 }
 0xe57   :  { %v1799_v41 = vmul.f32 20.0, %v1797_v39  ;;  %2534 = vrcp.f32 %v1996_v40 }
 0xe58   :  { %v1817_v42 = vrot.slane %v1816_v36, 1  ;;  %v1822_v45 = vrot.slane %v1821_v37, 2  ;;  %v1852_v46 = vmax.f32 %v1850_v35, %v1851_v38 }
 0xe59   :  { %v1857_v47 = vsel %vm1806_vm14, %v1799_v41, -inf }
 0xe5a   :  { %v1818_v48 = vmax.f32 %v1816_v36, %v1817_v42  ;;  %v1823_v49 = vmax.f32 %v1821_v37, %v1822_v45  ;;  %v1853_v50 = vrot.slane %v1852_v46, 2  ;;  %v1858_v13 = vrot.slane %v1857_v47, 4  ;;  %v1999_v51 = vpop.xlane.xlu0 %1998 }
 0xe5b   :  { %2536 = vrcp.f32 %v1999_v51 }
 0xe5c   :  { %v1826_v52 = vsub.f32 %v1760_v11, %v1818_v48  ;;  %v1824_v53 = vrot.slane %v1823_v49, 1  ;;  %v1854_v17 = vmax.f32 %v1852_v46, %v1853_v50  ;;  %v1859_v54 = vmax.f32 %v1857_v47, %v1858_v13 }
 0xe5e   :  { %v1828_v55 = vmul.f32 1.442695, %v1826_v52  ;;  %v1825_v56 = vmax.f32 %v1823_v49, %v1824_v53  ;;  %v1855_v57 = vrot.slane %v1854_v17, 1  ;;  %v1860_v8 = vrot.slane %v1859_v54, 2 }
 0xe60   :  { %2538 = vpow2.f32 %v1828_v55  ;;  %v1827_v10 = vsub.f32 %v1761_v25, %v1825_v56  ;;  %v1856_v58 = vmax.f32 %v1854_v17, %v1855_v57  ;;  %v1861_v20 = vmax.f32 %v1859_v54, %v1860_v8 }
 0xe61   :  { %v2535_v28 = vpop.eup %2534 }
 0xe62   :  { %v1830_v19 = vmul.f32 1.442695, %v1827_v10  ;;  %v1864_v59 = vsub.f32 %v1798_v32, %v1856_v58  ;;  %v1862_v5 = vrot.slane %v1861_v20, 1  ;;  %v2001_v60 = vmul.f32 %v2535_v28, %v3317_v18 }
 0xe64   :  { %2540 = vpow2.f32 %v1830_v19  ;;  %v1866_v44 = vmul.f32 1.442695, %v1864_v59  ;;  %v1863_v15 = vmax.f32 %v1861_v20, %v1862_v5  ;;  %2004 = vst.msk [vmem:[#allocation22] sm:$0xff] %vm1981_vm1, %v2001_v60 }
 0xe65   :  { %v2537_v62 = vpop.eup %2536 }
 0xe66   :  { %2542 = vpow2.f32 %v1866_v44  ;;  %v1865_v12 = vsub.f32 %v1799_v41, %v1863_v15  ;;  %v2003_v43 = vmul.f32 %v2537_v62, %v3323_v23 }
 0xe68   :  { %v1868_v0 = vmul.f32 1.442695, %v1865_v12  ;;  %2005 = vst.msk [vmem:[#allocation22 + $0x8] sm:$0xff] %vm1981_vm1, %v2003_v43 }
 0xe6a   :  { %v2539_v1 = vpop.eup %2538  ;;  %2544 = vpow2.f32 %v1868_v0 }
 0xe6b   :  { %v1832_v14 = vsel %vm1806_vm14, %v2539_v1, 0.0 }
 0xe6c   :  { %v1833_v2 = vrot.slane %v1832_v14, 4 }
 0xe6e   :  { %v2541_v9 = vpop.eup %2540  ;;  %v1834_v3 = vadd.f32 %v1833_v2, %v1832_v14 }
 0xe6f   :  { %v1839_v6 = vsel %vm1806_vm14, %v2541_v9, 0.0 }
 0xe70   :  { %v2543_v16 = vpop.eup %2542  ;;  %v1835_v61 = vrot.slane %v1834_v3, 2  ;;  %v1840_v18 = vrot.slane %v1839_v6, 4 }
 0xe71   :  { %v1870_v21 = vsel %vm1806_vm14, %v2543_v16, 0.0 }
 0xe72   :  { %v1836_v22 = vadd.f32 %v1835_v61, %v1834_v3  ;;  %v1841_v63 = vadd.f32 %v1840_v18, %v1839_v6  ;;  %v1871_v23 = vrot.slane %v1870_v21, 4 }
 0xe74   :  { %v2545_v26 = vpop.eup %2544  ;;  %v1837_v4 = vrot.slane %v1836_v22, 1  ;;  %v1842_v11 = vrot.slane %v1841_v63, 2  ;;  %v1872_v27 = vadd.f32 %v1871_v23, %v1870_v21 }
 0xe75   :  { %v1877_v7 = vsel %vm1806_vm14, %v2545_v26, 0.0 }
 0xe76   :  { %v1843_v29 = vadd.f32 %v1842_v11, %v1841_v63  ;;  %v1873_v25 = vrot.slane %v1872_v27, 2  ;;  %v1878_v30 = vrot.slane %v1877_v7, 4  ;;  %v1838_v24 = vadd.f32 %v1837_v4, %v1836_v22 }
 0xe78   :  { %v1844_v31 = vrot.slane %v1843_v29, 1  ;;  %v1874_v32 = vadd.f32 %v1873_v25, %v1872_v27  ;;  %v1879_v33 = vadd.f32 %v1878_v30, %v1877_v7  ;;  %2546 = vrcp.f32 %v1838_v24 }
 0xe7a   :  { %v1875_v34 = vrot.slane %v1874_v32, 1  ;;  %v1880_v35 = vrot.slane %v1879_v33, 2  ;;  %v1845_v36 = vadd.f32 %v1844_v31, %v1843_v29 }
 0xe7c   :  { %v1876_v37 = vadd.f32 %v1875_v34, %v1874_v32  ;;  %v1881_v38 = vadd.f32 %v1880_v35, %v1879_v33 }
 0xe7e   :  { %2548 = vrcp.f32 %v1876_v37  ;;  %v1882_v39 = vrot.slane %v1881_v38, 1 }
 0xe7f   :  { %2550 = vrcp.f32 %v1845_v36 }
 0xe80   :  { %v1883_v40 = vadd.f32 %v1882_v39, %v1881_v38 }
 0xe82   :  { %2552 = vrcp.f32 %v1883_v40  ;;  %v2547_v41 = vpop.eup %2546 }
 0xe83   :  { %v1847_v45 = vmul.f32 %v2547_v41, %v2539_v1 }
 0xe88   :  { %v2549_v42 = vpop.eup %2548 }
 0xe89   :  { %v1885_v46 = vmul.f32 %v2549_v42, %v2543_v16  ;;  %v2551_v47 = vpop.eup %2550 }
 0xe8a   :  { %v1849_v50 = vmul.f32 %v2551_v47, %v2541_v9 }
 0xe8b   :  { %v1889_v48 = vsel %vm1888_vm11, %v1847_v45, %v1885_v46 }
 0xe8c   :  { %v2553_v49 = vpop.eup %2552  ;;  %1892 = vst.msk [vmem:[#allocation20] sm:$0x1f] %vm1891_vm13, %v1889_v48 }
 0xe8d   :  { %v1887_v13 = vmul.f32 %v2553_v49, %v2545_v26 }
 0xe8f   :  { %v1890_v51 = vsel %vm1888_vm11, %v1849_v50, %v1887_v13 }
 0xe90   :  { %1893 = vst.msk [vmem:[#allocation20 + $0x8] sm:$0x1f] %vm1891_vm13, %v1890_v51 }
 0xe91   :  { %2807 = shalt.err (!%p2804_p8)
}
 0xe92   :  { %s2808_s23 = scalar_lea.hbm %s3476_s11, 256 }
 0xe93   :  { %p2809_p9 = scmp.ne.s32.totalorder %s3476_s11, %s2808_s23  ;;  %p2812_p10 = scmp.lt.u32.totalorder %s2808_s23, %s3476_s11 }
 0xe95   :  { %p2814_p11 = pnand %p2812_p10, %p2809_p9 }
 0xe97   :  { %2817 = shalt.err (!%p2814_p11)
}
 0xe98   :  { %2077 = dma.vmem_to_hbm [thread:$0]  %s2072_s15, 256, %s3476_s11, [#allocation21], %s2868_s17, %s2868_s17, %s2869_s18  }
 0xe99   :  { %s2818_s7 = scalar_lea.vmem %s3428_s26, 256  ;;  %p2823_p13 = scmp.lt.s32.totalorder %s3428_s26, %s3428_s26 }
 0xe9a   :  { %p2819_p12 = scmp.ne.s32.totalorder %s3428_s26, %s2818_s7  ;;  %p2824_p0 = scmp.lt.s32.totalorder %s2818_s7, %s2818_s7 }
 0xe9c   :  { %p2825_p1 = por %p2824_p0, %p2823_p13 }
 0xe9e   :  { %p2826_p2 = pnand %p2825_p1, %p2819_p12 }
 0xea0   :  { %2829 = shalt.err (!%p2826_p2)
}
 0xea1   :  { %s2830_s28 = scalar_lea.hbm %s3477_s12, 256 }
 0xea2   :  { %p2831_p3 = scmp.ne.s32.totalorder %s3477_s12, %s2830_s28  ;;  %p2834_p4 = scmp.lt.u32.totalorder %s2830_s28, %s3477_s12 }
 0xea4   :  { %p2836_p5 = pnand %p2834_p4, %p2831_p3 }
 0xea6   :  { %2839 = shalt.err (!%p2836_p5)
}
 0xea7   :  { %2089 = dma.vmem_to_hbm [thread:$0]  %s3428_s26, 256, %s3477_s12, [#allocation21], %s2868_s17, %s2868_s17, %s2869_s18  }
 0xea8   :  { %2848 = dma.done.wait [#allocation4], 512  }
 0xea9   :  { %2849 = vsyncadd [#allocation4], 4294966784 }
 0xeaa   :  { %2850 = dma.done.wait [#allocation15], 768  }
 0xeab   :  { %2851 = vsyncadd [#allocation15], 4294966528 }
 0xeac   :  { %2852 = dma.done.wait [#allocation18], 512  }
 0xead   :  { %2853 = vsyncadd [#allocation18], 4294966784 }
 0xeae   :  { %2854 = dma.done.wait [#allocation21], 512  }
 0xeaf   :  { %2855 = vsyncadd [#allocation21], 4294966784 }
 0xeb0   :  { %2111 = vsyncpa [#allocation3], 1 }
 0xeb1   :  { %2112 = vsyncpa [#allocation6], 1 }
 0xeb2   :  { %2113 = vsyncpa [#allocation9], 1 }
 0xeb3   :  { %2114 = vsyncpa [#allocation12], 1 }
 0xeb4   :  { %2115 = vsyncpa [#allocation4], 1 }
 0xeb5   :  { %2116 = vsyncpa [#allocation15], 1 }
 0xeb6   :  { %2117 = vsyncpa [#allocation18], 1 }
 0xeb7   :  { %2118 = vsyncpa [#allocation21], 1 }

</bundles_post_ra>
